<compile_context>
chip_gen: v7x
topology: tpu7x:2x2x1
jax: 0.10.0
libtpu: 0.0.40
codegen_flags: <defaults>
</compile_context>

<pallas_src>
import functools
import math

import jax
import jax.numpy as jnp
from jax import lax
from jax.experimental import pallas as pl
from jax.experimental.pallas import tpu as pltpu


def _sagcn_kernel(xt_ref, adjt_ref, bias_ref, wt_ref, out_ref,
                  *, Bb, T, N, F_in, F_out):
    f32 = jnp.float32
    TN = T * N
    inv_sqrt_f = 1.0 / math.sqrt(F_in)

    adj = adjt_ref[...]        # (TN, TN): bf16 on v6e/v7x, f32 on v5e-and-older
    bias = bias_ref[...]       # (TN, TN) f32 additive mask: 0 same-t, finfo.min else
    wt = wt_ref[...]           # (F_in, F_out) bf16; post-softmax 1/sqrt(F_in) folded in

    for i in range(Bb):        # Bb is a small static constant -> unrolled
        x = xt_ref[i].reshape(TN, F_in)                       # (T*N, F_in) f32, time-major

        # --- attention logits for all T in one MXU pass (f32 operands) -------
        g = lax.dot_general(x * inv_sqrt_f, x, (((1,), (1,)), ((), ())),
                            preferred_element_type=f32)       # (TN, TN) = (x/√F) @ x^T
        s = g + bias                                          # cross-time -> ~-inf

        # --- row softmax (over same-t N columns), f32 numerics ----------------
        m = jnp.max(s, axis=-1, keepdims=True)
        e = jnp.exp(s - m)                                    # off-block -> exactly 0
        p = e * pl.reciprocal(jnp.sum(e, axis=-1, keepdims=True), approx=True)
        # TODO(synk): dropout with p > 0 not implemented (module default p=0.0).

        # --- adjacency-gated aggregation + Theta projection + relu -----------
        w = adj * p.astype(adj.dtype)                         # A_sym ⊙ att (per-chip dtype)
        h = jnp.dot(w.astype(jnp.bfloat16), x.astype(jnp.bfloat16),
                    preferred_element_type=f32)               # (TN, F_in)
        y = jnp.dot(h.astype(jnp.bfloat16), wt, preferred_element_type=f32)
        out_ref[i] = jnp.maximum(y, 0.0).reshape(T, N, F_out).astype(out_ref.dtype)


def spatial_attention_scaled_gcn(x, adj, theta_w, *, batch_block=1):
    """x: (B, N, T, F_in) f32, adj: (N, N) f32, theta_w: (F_in, F_out) f32."""
    B, N, T, F_in = x.shape
    F_out = theta_w.shape[1]
    TN = T * N
    inv_sqrt_f = 1.0 / math.sqrt(F_in)

    Bb = batch_block if (batch_block >= 1 and B % batch_block == 0) else 1

    # v6e/v7x: native bf16 VPU -> carry the post-softmax gating chain in bf16.
    # v5e and older: no bf16 VPU/EUP -> keep the elementwise chain in f32 and
    # only cast at the MXU boundary.
    try:
        kind = jax.devices()[0].device_kind.lower()
    except Exception:  # pragma: no cover - defensive; default to the safe path
        kind = ""
    gate_dtype = jnp.bfloat16 if ("v6" in kind or "v7" in kind) else jnp.float32

    # host-side (XLA) layout prep:
    xt = jnp.transpose(x, (0, 2, 1, 3)).astype(jnp.float32)      # (B, T, N, F_in)
    adj_tiled = jnp.tile(adj, (T, T)).astype(gate_dtype)         # (T*N, T*N)
    tidx = jnp.arange(TN) // N
    bias = jnp.where(tidx[:, None] == tidx[None, :],
                     0.0, jnp.finfo(jnp.float32).min).astype(jnp.float32)
    wt = (theta_w * inv_sqrt_f).astype(jnp.bfloat16)             # fold post-softmax scale

    kernel = functools.partial(_sagcn_kernel, Bb=Bb, T=T, N=N,
                               F_in=F_in, F_out=F_out)

    out = pl.pallas_call(
        kernel,
        grid_spec=pltpu.PrefetchScalarGridSpec(
            num_scalar_prefetch=0,
            grid=(B // Bb,),
            in_specs=[
                pl.BlockSpec((Bb, T, N, F_in), lambda b: (b, 0, 0, 0)),
                pl.BlockSpec((TN, TN), lambda b: (0, 0)),        # adj_tiled (constant)
                pl.BlockSpec((TN, TN), lambda b: (0, 0)),        # mask bias (constant)
                pl.BlockSpec((F_in, F_out), lambda b: (0, 0)),   # Theta (constant)
            ],
            out_specs=pl.BlockSpec((Bb, T, N, F_out), lambda b: (b, 0, 0, 0)),
        ),
        out_shape=jax.ShapeDtypeStruct((B, T, N, F_out), jnp.float32),
        compiler_params=pltpu.CompilerParams(dimension_semantics=("parallel",)),
    )(xt, adj_tiled, bias, wt)

    return jnp.transpose(out, (0, 2, 1, 3))                      # (B, N, T, F_out)


def reference(x, adj, theta_w):
    """Plain-JAX reference mirroring the PyTorch forward."""
    B, N, T, F_in = x.shape
    xt = jnp.transpose(x, (0, 2, 1, 3)).reshape(B * T, N, F_in)
    score = jnp.einsum('bnf,bmf->bnm', xt, xt) / math.sqrt(F_in)
    att = jax.nn.softmax(score, axis=-1) / math.sqrt(F_in)
    h = jnp.einsum('bnm,bmf->bnf', adj[None] * att, xt)
    y = jnp.maximum(jnp.einsum('bnf,fo->bno', h, theta_w), 0.0)
    return y.reshape(B, T, N, -1).transpose(0, 2, 1, 3)           # (B, N, T, F_out)


if __name__ == "__main__":
    B, N, T, F_in, F_out = 4, 16, 8, 32, 64      # TN = 128 -> full-lane MXU tiles

    root = jax.random.PRNGKey(0)
    kx, ka, kw = jax.random.split(root, 3)

    x = jax.random.normal(kx, (B, N, T, F_in), jnp.float32)

    # symmetric-normalized adjacency  D^{-1/2} (A + I) D^{-1/2}
    a = (jax.random.uniform(ka, (N, N)) > 0.6).astype(jnp.float32)
    a = jnp.maximum(a, a.T) + jnp.eye(N, dtype=jnp.float32)
    dinv = 1.0 / jnp.sqrt(jnp.sum(a, axis=1))
    adj = a * dinv[:, None] * dinv[None, :]

    # Theta: nn.Linear(F_in, F_out, bias=False); weight stored transposed (F_in, F_out)
    theta_w = jax.random.normal(kw, (F_in, F_out), jnp.float32) / math.sqrt(F_in)

    out = spatial_attention_scaled_gcn(x, adj, theta_w, batch_block=2)
    out = jax.block_until_ready(out)

    ref = reference(x, adj, theta_w)
    err = float(jnp.max(jnp.abs(out - ref)))
    ref_max = float(jnp.max(jnp.abs(ref)))
    assert out.shape == (B, N, T, F_out)
    # bf16 MXU operands for aggregation/Theta + approx reciprocal -> relative tol
    assert err < max(1e-3, 5e-2 * ref_max), f"max abs error {err} (ref max {ref_max})"
    print("KERNEL_OK")
</pallas_src>

<mosaic_0001>
module attributes {stable_mosaic.version = 11 : i64} {
  func.func @_sagcn_kernel(%arg0: i32, %arg1: memref<2x8x16x32xf32, #tpu.memory_space<vmem>>, %arg2: memref<128x128xf32, #tpu.memory_space<vmem>>, %arg3: memref<128x128xf32, #tpu.memory_space<vmem>>, %arg4: memref<32x64xbf16, #tpu.memory_space<vmem>>, %arg5: memref<2x8x16x64xf32, #tpu.memory_space<vmem>>) attributes {dimension_semantics = [#tpu.dimension_semantics<parallel>], iteration_bounds = array<i64: 2>, scalar_prefetch = 0 : i64, scratch_operands = 0 : i64, tpu.core_type = #tpu.core_type<tc>, window_params = [{transform_indices = @transform_0, window_bounds = array<i64: 2, 8, 16, 32>}, {pipeline_mode = #tpu.pipeline_mode<synchronous>, transform_indices = @transform_1, window_bounds = array<i64: 128, 128>}, {pipeline_mode = #tpu.pipeline_mode<synchronous>, transform_indices = @transform_2, window_bounds = array<i64: 128, 128>}, {pipeline_mode = #tpu.pipeline_mode<synchronous>, transform_indices = @transform_3, window_bounds = array<i64: 32, 64>}, {transform_indices = @transform_4, window_bounds = array<i64: 2, 8, 16, 64>}]} {
    %c0 = arith.constant 0 : index
    %c0_0 = arith.constant 0 : index
    %0 = vector.load %arg2[%c0, %c0_0] : memref<128x128xf32, #tpu.memory_space<vmem>>, vector<128x128xf32>
    %c0_1 = arith.constant 0 : index
    %c0_2 = arith.constant 0 : index
    %1 = vector.load %arg3[%c0_1, %c0_2] : memref<128x128xf32, #tpu.memory_space<vmem>>, vector<128x128xf32>
    %c0_3 = arith.constant 0 : index
    %c0_4 = arith.constant 0 : index
    %2 = vector.load %arg4[%c0_3, %c0_4] : memref<32x64xbf16, #tpu.memory_space<vmem>>, vector<32x64xbf16>
    %c0_5 = arith.constant 0 : index
    %c0_6 = arith.constant 0 : index
    %c0_7 = arith.constant 0 : index
    %c0_8 = arith.constant 0 : index
    %3 = vector.load %arg1[%c0_5, %c0_6, %c0_7, %c0_8] : memref<2x8x16x32xf32, #tpu.memory_space<vmem>>, vector<1x8x16x32xf32>
    %4 = vector.shape_cast %3 : vector<1x8x16x32xf32> to vector<8x16x32xf32>
    %5 = vector.shape_cast %4 : vector<8x16x32xf32> to vector<128x32xf32>
    %cst = arith.constant 0.176776692 : f32
    %6 = vector.broadcast %cst : f32 to vector<128x32xf32>
    %7 = arith.mulf %5, %6 : vector<128x32xf32>
    %cst_9 = arith.constant dense<0.000000e+00> : vector<128x128xf32>
    %8 = tpu.matmul %7, %5, %cst_9 {dimension_numbers = #tpu.dot_dimension_numbers<[1], [1], [0], [0], [0, 0, 1, 0], [], []>} : vector<128x32xf32>, vector<128x32xf32>, vector<128x128xf32> -> vector<128x128xf32>
    %9 = arith.addf %8, %1 : vector<128x128xf32>
    %cst_10 = arith.constant dense<0xFF800000> : vector<128xf32>
    %10 = vector.multi_reduction <maximumf>, %9, %cst_10 [1] : vector<128x128xf32> to vector<128xf32>
    %11 = vector.shape_cast %10 : vector<128xf32> to vector<128x1xf32>
    %12 = vector.broadcast %11 : vector<128x1xf32> to vector<128x128xf32>
    %13 = arith.subf %9, %12 : vector<128x128xf32>
    %14 = math.exp %13 : vector<128x128xf32>
    %cst_11 = arith.constant dense<0.000000e+00> : vector<128xf32>
    %15 = vector.multi_reduction <add>, %14, %cst_11 [1] : vector<128x128xf32> to vector<128xf32>
    %16 = vector.shape_cast %15 : vector<128xf32> to vector<128x1xf32>
    %17 = tpu.reciprocal %16 {approx = true} : vector<128x1xf32> -> vector<128x1xf32>
    %18 = vector.broadcast %17 : vector<128x1xf32> to vector<128x128xf32>
    %19 = arith.mulf %14, %18 : vector<128x128xf32>
    %20 = arith.mulf %0, %19 : vector<128x128xf32>
    %21 = arith.truncf %20 : vector<128x128xf32> to vector<128x128xbf16>
    %22 = arith.truncf %5 : vector<128x32xf32> to vector<128x32xbf16>
    %cst_12 = arith.constant dense<0.000000e+00> : vector<128x32xf32>
    %23 = tpu.matmul %21, %22, %cst_12 {dimension_numbers = #tpu.dot_dimension_numbers<[1], [0], [0], [1], [0, 0, 1, 1], [], []>} : vector<128x128xbf16>, vector<128x32xbf16>, vector<128x32xf32> -> vector<128x32xf32>
    %24 = arith.truncf %23 : vector<128x32xf32> to vector<128x32xbf16>
    %cst_13 = arith.constant dense<0.000000e+00> : vector<128x64xf32>
    %25 = tpu.matmul %24, %2, %cst_13 {dimension_numbers = #tpu.dot_dimension_numbers<[1], [0], [0], [1], [0, 0, 1, 1], [], []>} : vector<128x32xbf16>, vector<32x64xbf16>, vector<128x64xf32> -> vector<128x64xf32>
    %cst_14 = arith.constant 0.000000e+00 : f32
    %26 = vector.broadcast %cst_14 : f32 to vector<128x64xf32>
    %27 = arith.maximumf %25, %26 : vector<128x64xf32>
    %28 = vector.shape_cast %27 : vector<128x64xf32> to vector<8x16x64xf32>
    %c0_15 = arith.constant 0 : index
    %c0_16 = arith.constant 0 : index
    %c0_17 = arith.constant 0 : index
    %c0_18 = arith.constant 0 : index
    %29 = vector.load %arg5[%c0_15, %c0_16, %c0_17, %c0_18] : memref<2x8x16x64xf32, #tpu.memory_space<vmem>>, vector<1x8x16x64xf32>
    %30 = vector.shape_cast %29 : vector<1x8x16x64xf32> to vector<8x16x64xf32>
    %31 = vector.shape_cast %28 : vector<8x16x64xf32> to vector<1x8x16x64xf32>
    tpu.vector_store %arg5[%c0_15, %c0_16, %c0_17, %c0_18], %31 {strides = array<i32>} : memref<2x8x16x64xf32, #tpu.memory_space<vmem>>, vector<1x8x16x64xf32>,
    %c1 = arith.constant 1 : index
    %c0_19 = arith.constant 0 : index
    %c0_20 = arith.constant 0 : index
    %c0_21 = arith.constant 0 : index
    %32 = vector.load %arg1[%c1, %c0_19, %c0_20, %c0_21] : memref<2x8x16x32xf32, #tpu.memory_space<vmem>>, vector<1x8x16x32xf32>
    %33 = vector.shape_cast %32 : vector<1x8x16x32xf32> to vector<8x16x32xf32>
    %34 = vector.shape_cast %33 : vector<8x16x32xf32> to vector<128x32xf32>
    %cst_22 = arith.constant 0.176776692 : f32
    %35 = vector.broadcast %cst_22 : f32 to vector<128x32xf32>
    %36 = arith.mulf %34, %35 : vector<128x32xf32>
    %cst_23 = arith.constant dense<0.000000e+00> : vector<128x128xf32>
    %37 = tpu.matmul %36, %34, %cst_23 {dimension_numbers = #tpu.dot_dimension_numbers<[1], [1], [0], [0], [0, 0, 1, 0], [], []>} : vector<128x32xf32>, vector<128x32xf32>, vector<128x128xf32> -> vector<128x128xf32>
    %38 = arith.addf %37, %1 : vector<128x128xf32>
    %cst_24 = arith.constant dense<0xFF800000> : vector<128xf32>
    %39 = vector.multi_reduction <maximumf>, %38, %cst_24 [1] : vector<128x128xf32> to vector<128xf32>
    %40 = vector.shape_cast %39 : vector<128xf32> to vector<128x1xf32>
    %41 = vector.broadcast %40 : vector<128x1xf32> to vector<128x128xf32>
    %42 = arith.subf %38, %41 : vector<128x128xf32>
    %43 = math.exp %42 : vector<128x128xf32>
    %cst_25 = arith.constant dense<0.000000e+00> : vector<128xf32>
    %44 = vector.multi_reduction <add>, %43, %cst_25 [1] : vector<128x128xf32> to vector<128xf32>
    %45 = vector.shape_cast %44 : vector<128xf32> to vector<128x1xf32>
    %46 = tpu.reciprocal %45 {approx = true} : vector<128x1xf32> -> vector<128x1xf32>
    %47 = vector.broadcast %46 : vector<128x1xf32> to vector<128x128xf32>
    %48 = arith.mulf %43, %47 : vector<128x128xf32>
    %49 = arith.mulf %0, %48 : vector<128x128xf32>
    %50 = arith.truncf %49 : vector<128x128xf32> to vector<128x128xbf16>
    %51 = arith.truncf %34 : vector<128x32xf32> to vector<128x32xbf16>
    %cst_26 = arith.constant dense<0.000000e+00> : vector<128x32xf32>
    %52 = tpu.matmul %50, %51, %cst_26 {dimension_numbers = #tpu.dot_dimension_numbers<[1], [0], [0], [1], [0, 0, 1, 1], [], []>} : vector<128x128xbf16>, vector<128x32xbf16>, vector<128x32xf32> -> vector<128x32xf32>
    %53 = arith.truncf %52 : vector<128x32xf32> to vector<128x32xbf16>
    %cst_27 = arith.constant dense<0.000000e+00> : vector<128x64xf32>
    %54 = tpu.matmul %53, %2, %cst_27 {dimension_numbers = #tpu.dot_dimension_numbers<[1], [0], [0], [1], [0, 0, 1, 1], [], []>} : vector<128x32xbf16>, vector<32x64xbf16>, vector<128x64xf32> -> vector<128x64xf32>
    %cst_28 = arith.constant 0.000000e+00 : f32
    %55 = vector.broadcast %cst_28 : f32 to vector<128x64xf32>
    %56 = arith.maximumf %54, %55 : vector<128x64xf32>
    %57 = vector.shape_cast %56 : vector<128x64xf32> to vector<8x16x64xf32>
    %c1_29 = arith.constant 1 : index
    %c0_30 = arith.constant 0 : index
    %c0_31 = arith.constant 0 : index
    %c0_32 = arith.constant 0 : index
    %58 = vector.load %arg5[%c1_29, %c0_30, %c0_31, %c0_32] : memref<2x8x16x64xf32, #tpu.memory_space<vmem>>, vector<1x8x16x64xf32>
    %59 = vector.shape_cast %58 : vector<1x8x16x64xf32> to vector<8x16x64xf32>
    %60 = vector.shape_cast %57 : vector<8x16x64xf32> to vector<1x8x16x64xf32>
    tpu.vector_store %arg5[%c1_29, %c0_30, %c0_31, %c0_32], %60 {strides = array<i32>} : memref<2x8x16x64xf32, #tpu.memory_space<vmem>>, vector<1x8x16x64xf32>,
    return
  }
  func.func @transform_0(%arg0: i32) -> (i32, i32, i32, i32) {
    %c0_i32 = arith.constant 0 : i32
    %c0_i32_0 = arith.constant 0 : i32
    %c0_i32_1 = arith.constant 0 : i32
    %c0_i32_2 = arith.constant 0 : i32
    return %arg0, %c0_i32, %c0_i32_0, %c0_i32_1 : i32, i32, i32, i32
  }
  func.func @transform_1(%arg0: i32) -> (i32, i32) {
    %c0_i32 = arith.constant 0 : i32
    %c0_i32_0 = arith.constant 0 : i32
    %c0_i32_1 = arith.constant 0 : i32
    return %c0_i32, %c0_i32_0 : i32, i32
  }
  func.func @transform_2(%arg0: i32) -> (i32, i32) {
    %c0_i32 = arith.constant 0 : i32
    %c0_i32_0 = arith.constant 0 : i32
    %c0_i32_1 = arith.constant 0 : i32
    return %c0_i32, %c0_i32_0 : i32, i32
  }
  func.func @transform_3(%arg0: i32) -> (i32, i32) {
    %c0_i32 = arith.constant 0 : i32
    %c0_i32_0 = arith.constant 0 : i32
    %c0_i32_1 = arith.constant 0 : i32
    return %c0_i32, %c0_i32_0 : i32, i32
  }
  func.func @transform_4(%arg0: i32) -> (i32, i32, i32, i32) {
    %c0_i32 = arith.constant 0 : i32
    %c0_i32_0 = arith.constant 0 : i32
    %c0_i32_1 = arith.constant 0 : i32
    %c0_i32_2 = arith.constant 0 : i32
    return %arg0, %c0_i32, %c0_i32_0, %c0_i32_1 : i32, i32, i32, i32
  }
}

</mosaic_0001>

<bundles_post_ra>
// kernel: tpu_custom_call.1
= control target key start
LH: loop header
LB: loop body
LE: loop exit
PB: predicated region body
PF: predicated region fallthrough
CT: control target
= control target key end

     0   :  { %9 = vsyncpa [#allocation3], 0  ;;  %s3781_s0 = inlined_call_operand.hbm [shape: f32[4,8,16,32], index: 0, kind: input, shape index: {}]   ;;  %s3782_s1 = inlined_call_operand.hbm [shape: f32[128,128], index: 1, kind: input, shape index: {}]   ;;  %s3783_s2 = inlined_call_operand.hbm [shape: f32[128,128], index: 2, kind: input, shape index: {}]   ;;  %s3784_s3 = inlined_call_operand.hbm [shape: bf16[32,64], index: 3, kind: input, shape index: {}]   ;;  %s3785_s4 = inlined_call_operand.hbm [shape: f32[4,8,16,64], index: 4, kind: output, shape index: {}]  }
   0x1   :  { %11 = vsyncpa [#allocation3 + $0x1], 0 }
   0x2   :  { %12 = vsyncpa [#allocation6], 0 }
   0x3   :  { %13 = vsyncpa [#allocation9], 0 }
   0x4   :  { %14 = vsyncpa [#allocation4], 0 }
   0x5   :  { %16 = vsyncpa [#allocation4 + $0x1], 0  ;;  %s2854_s15 = smov 0   ;;  %s2856_s16 = smov 0  }
   0x6   :  { %s2858_s17 = smov 0   ;;  %s2860_s18 = smov 0  }
   0x7 LB: > { %s2875_s19 = sadd.s32 4294967295, %s2816_s18   ;;  %s1847_s20 = sadd.s32 4294967294, %s2816_s18   ;;  %s2816_s18 = sphi %s2860_s18, %s3810_s18   ;;  %s2812_s17 = sphi %s2858_s17, %s3809_s17   ;;  %s2808_s16 = sphi %s2856_s16, %s3808_s16   ;;  %s2804_s15 = sphi %s2854_s15, %s3807_s15  }
   0x8   : > { %p42_p0 = scmp.ne.s32.totalorder %s2808_s16, %s2804_s15  ;;  %p3786_p1 = scmp.eq.s32.totalorder %s2875_s19, 0 }
   0x9   : > { %p135_p3 = scmp.eq.s32.totalorder %s1847_s20, 1  ;;  %p1848_p5 = scmp.ge.s32.totalorder %s2816_s18, 1 }
   0xa   : > { %p2884_p4 = por %p3786_p1, %p42_p0  ;;  %p142_p7 = scmp.lt.s32.totalorder %s2816_s18, 3 }
   0xb   : > { %p2889_p6 = por %p135_p3, %p42_p0  ;;  %s2818_s24 = smov [#allocation5]  }
   0xc   : > { %s3789_s21 = scalar_select %p2884_p4, 1, 0 }
   0xd   : > { %s3790_s22 = scalar_select %p2889_p6, 1, 0 }
   0xe   : > { %p2894_p8 = pnand %p1848_p5, %p142_p7  ;;  %s154_s25 = sshll.u32 %s2818_s24, 4  ;;  %s2898_s25 = int_to_ptr.vmem [resolvable:$true] %s154_s25 }
   0xf   : > { %s2819_s27 = smov [#allocation7]   ;;  %s2820_s29 = smov [#allocation8]  }
  0x10   : > { %s3791_s23 = scalar_select %p2894_p8, 1, 0 }
  0x11   : > { %p2431_p9 = pneg %p2894_p8  ;;  %s167_s28 = sshll.u32 %s2819_s27, 4  ;;  %s2909_s28 = int_to_ptr.vmem [resolvable:$true] %s167_s28 }
  0x12   : > { %s2911_s30 = sshll.u32 %s2820_s29, 4  ;;  %s2628_s7 = scalar_lea.hbm %s3782_s1, 2048  ;;  %s181_s30 = int_to_ptr.vmem [resolvable:$true] %s2911_s30 }
  0x13   : > { %p2905_p11 = pnand %p2431_p9, %p3786_p1  ;;  %p2629_p12 = scmp.ne.s32.totalorder %s3782_s1, %s2628_s7 }
  0x14   : > { %p2635_p5 = scmp.lt.u32.totalorder %s2628_s7, %s3782_s1 }
  0x15   : > { %p2921_p13 = pneg %p2905_p11 }
  0x17   : > { %p2631_p0 = pnand %p2921_p13, %p2629_p12 }
  0x19   : > { %p2632_p3 = pneg %p2631_p0 }
  0x1b   : > { %p2637_p7 = pnand %p2635_p5, %p2632_p3 }
  0x1d   : > { %2640 = shalt.err (!%p2637_p7)
}
  0x1e   : > { %s2641_s13 = scalar_lea.vmem %s2898_s25, 2048  ;;  %p2649_p2 = scmp.lt.s32.totalorder %s2898_s25, %s2898_s25 }
  0x1f   : > { %p2642_p9 = scmp.ne.s32.totalorder %s2898_s25, %s2641_s13  ;;  %p2650_p6 = scmp.lt.s32.totalorder %s2641_s13, %s2641_s13 }
  0x21   : > { %p2644_p10 = pnand %p2642_p9, %p2921_p13  ;;  %p2651_p12 = por %p2650_p6, %p2649_p2 }
  0x23   : > { %p2645_p1 = pneg %p2644_p10 }
  0x25   : > { %p2652_p0 = pnand %p2651_p12, %p2645_p1 }
  0x27   : > { %2655 = shalt.err (!%p2652_p0)
}
  0x28   : > { %s2821_s14 = smov 128   ;;  %s2822_s20 = smov 8  }
  0x29   : > { %2434 = dma.hbm_to_vmem [thread:$0]  (!%p2905_p11), %s3782_s1, 2048, %s2898_s25, [#allocation6], %s2821_s14, %s2821_s14, %s2822_s20  }
  0x2a   : > { %s2656_s6 = scalar_lea.hbm %s3783_s2, 2048 }
  0x2b   : > { %p2657_p1 = scmp.ne.s32.totalorder %s3783_s2, %s2656_s6  ;;  %p2663_p10 = scmp.lt.u32.totalorder %s2656_s6, %s3783_s2 }
  0x2d   : > { %p2659_p2 = pnand %p2657_p1, %p2921_p13 }
  0x2f   : > { %p2660_p6 = pneg %p2659_p2 }
  0x31   : > { %p2665_p3 = pnand %p2663_p10, %p2660_p6 }
  0x33   : > { %2668 = shalt.err (!%p2665_p3)
}
  0x34   : > { %s2669_s25 = scalar_lea.vmem %s2909_s28, 2048  ;;  %p2677_p12 = scmp.lt.s32.totalorder %s2909_s28, %s2909_s28 }
  0x35   : > { %p2670_p5 = scmp.ne.s32.totalorder %s2909_s28, %s2669_s25  ;;  %p2678_p0 = scmp.lt.s32.totalorder %s2669_s25, %s2669_s25 }
  0x37   : > { %p2672_p7 = pnand %p2670_p5, %p2921_p13  ;;  %p2679_p1 = por %p2678_p0, %p2677_p12 }
  0x39   : > { %p2673_p9 = pneg %p2672_p7 }
  0x3b   : > { %p2680_p2 = pnand %p2679_p1, %p2673_p9 }
  0x3d   : > { %2683 = shalt.err (!%p2680_p2)
}
  0x3e   : > { %2437 = dma.hbm_to_vmem [thread:$0]  (!%p2905_p11), %s3783_s2, 2048, %s2909_s28, [#allocation6], %s2821_s14, %s2821_s14, %s2822_s20  }
  0x3f   : > { %s2684_s29 = scalar_lea.hbm %s3784_s3, 256 }
  0x40   : > { %p2685_p6 = scmp.ne.s32.totalorder %s3784_s3, %s2684_s29  ;;  %p2691_p5 = scmp.lt.u32.totalorder %s2684_s29, %s3784_s3 }
  0x42   : > { %p2687_p10 = pnand %p2685_p6, %p2921_p13 }
  0x44   : > { %p2688_p3 = pneg %p2687_p10 }
  0x46   : > { %p2693_p7 = pnand %p2691_p5, %p2688_p3 }
  0x48   : > { %2696 = shalt.err (!%p2693_p7)
}
  0x49   : > { %s2697_s9 = scalar_lea.vmem %s181_s30, 256  ;;  %p2705_p1 = scmp.lt.s32.totalorder %s181_s30, %s181_s30 }
  0x4a   : > { %p2698_p9 = scmp.ne.s32.totalorder %s181_s30, %s2697_s9  ;;  %p2706_p2 = scmp.lt.s32.totalorder %s2697_s9, %s2697_s9 }
  0x4c   : > { %p2700_p12 = pnand %p2698_p9, %p2921_p13  ;;  %p2707_p4 = por %p2706_p2, %p2705_p1 }
  0x4e   : > { %p2701_p0 = pneg %p2700_p12 }
  0x50   : > { %p2708_p8 = pnand %p2707_p4, %p2701_p0 }
  0x52   : > { %2711 = shalt.err (!%p2708_p8)
}
  0x53   : > { %s2823_s28 = smov 64   ;;  %s2824_s10 = smov 4  }
  0x54   : > { %2440 = dma.hbm_to_vmem [thread:$0]  (!%p2905_p11), %s3784_s3, 256, %s181_s30, [#allocation9], %s2823_s28, %s2823_s28, %s2824_s10  }
  0x55   : > { %s2991_s12 = sadd.s32 1, %s2816_s18   ;;  %s29_s24 = sadd.s32 1, %s2812_s17 }
  0x56   : > { %s26_s13 = ssub.s32 %s2816_s18, %s2991_s12  ;;  %p36_p8 = scmp.ne.s32.totalorder %s2812_s17, %s2808_s16 }
  0x57   : > { %p27_p4 = scmp.eq.s32.totalorder %s26_s13, 0  ;;  %p37_p13 = scmp.eq.s32.totalorder %s2816_s18, 0 }
  0x58   : > { %p2452_p6 = scmp.lt.s32.totalorder %s2816_s18, 2  ;;  %p3794_p3 = scmp.eq.s32.totalorder %s2875_s19, 1 }
  0x59   : > { %s3001_s27 = scalar_select %p27_p4, %s2812_s17, %s29_s24  }
  0x5a   : > { %p38_p10 = por %p37_p13, %p36_p8  ;;  %p3005_p5 = por %p3794_p3, %p36_p8 }
  0x5b   : > { %s194_s26 = sand.u32 1, %s2812_s17   ;;  %s1984_s5 = sshll.u32 %s2816_s18, 12 }
  0x5c   : > { %s1853_s30 = sshll.u32 %s194_s26, 8  ;;  %s3014_s8 = scalar_lea.hbm %s3781_s0, %s1984_s5 }
  0x5d   : > { %s198_s9 = scalar_lea.vmem [#allocation2], %s1853_s30  ;;  %p3016_p11 = pnand %p2452_p6, %p38_p10 }
  0x5e   : > { %s206_s28 = sshll.u32 %s198_s9, 4  ;;  %s3022_s11 = scalar_lea.sflag [#allocation3], %s194_s26  ;;  %s3020_s28 = int_to_ptr.vmem [resolvable:$true] %s206_s28 }
  0x5f   : > { %s2712_s25 = scalar_lea.hbm %s3014_s8, 4096  ;;  %p2714_p9 = pneg %p3016_p11 }
  0x60   : > { %p2713_p7 = scmp.ne.s32.totalorder %s3014_s8, %s2712_s25  ;;  %s2717_s5 = scalar_lea.hbm %s3781_s0, 8192 }
  0x61   : > { %p2718_p1 = scmp.lt.u32.totalorder %s3014_s8, %s3781_s0  ;;  %p2719_p2 = scmp.lt.u32.totalorder %s2717_s5, %s2712_s25 }
  0x62   : > { %p2715_p12 = pnand %p2714_p9, %p2713_p7  ;;  %p2721_p8 = scmp.lt.u32.totalorder %s2712_s25, %s3014_s8 }
  0x63   : > { %p2720_p4 = por %p2719_p2, %p2718_p1 }
  0x64   : > { %p2716_p0 = pneg %p2715_p12 }
  0x65   : > { %p2722_p13 = por %p2721_p8, %p2720_p4 }
  0x67   : > { %p2723_p6 = pnand %p2722_p13, %p2716_p0 }
  0x69   : > { %2726 = shalt.err (!%p2723_p6)
}
  0x6a   : > { %s2727_s26 = scalar_lea.vmem %s3020_s28, 4096  ;;  %s2825_s7 = smov [#allocation2]  }
  0x6b   : > { %p2728_p10 = scmp.ne.s32.totalorder %s3020_s28, %s2727_s26  ;;  %s2732_s9 = sshll.u32 %s2825_s7, 4  ;;  %s2733_s9 = int_to_ptr.vmem [resolvable:$false] %s2732_s9 }
  0x6c   : > { %s2734_s13 = scalar_lea.vmem %s2733_s9, 8192  ;;  %p2735_p12 = scmp.lt.s32.totalorder %s3020_s28, %s2733_s9 }
  0x6d   : > { %p2730_p3 = pnand %p2728_p10, %p2714_p9  ;;  %p2736_p1 = scmp.lt.s32.totalorder %s2734_s13, %s2727_s26 }
  0x6f   : > { %p2731_p7 = pneg %p2730_p3  ;;  %p2737_p2 = por %p2736_p1, %p2735_p12 }
  0x71   : > { %p2738_p4 = pnand %p2737_p2, %p2731_p7 }
  0x73   : > { %2741 = shalt.err (!%p2738_p4)
}
  0x74   : > { %2444 = dma.hbm_to_vmem [thread:$0]  (!%p3016_p11), %s3014_s8, 4096, %s3020_s28, %s3022_s11, %s2821_s14, %s2821_s14, %s2822_s20  }
  0x75   : > { %p3797_p9 = scmp.ne.s32.totalorder %s3791_s23, 0 }
  0x76   : > { %s3056_s25 = sand.u32 (!%p3797_p9), 1, %s2808_s16   ;;  %p3798_p0 = scmp.ne.s32.totalorder (!%p3797_p9), %s3789_s21, 0 }
  0x77   : > { %218 = sbr.rel (%p3797_p9) target bundleno = 1464 (0x5b8), region = 36  ;;  %s1858_s24 = sshll.u32 (!%p3797_p9), %s3056_s25, 8 }
  0x78   : > { %s221_s5 = scalar_lea.sflag (!%p3797_p9), [#allocation3], %s3056_s25  ;;  %s3062_s10 = scalar_lea.vmem (!%p3797_p9), [#allocation2], %s1858_s24 }
  0x7e   : > { %2787 = dma.done.wait (%p3798_p0), %s221_s5, 4096  }
  0x7f   : > { %2789 = vsyncadd (%p3798_p0), %s221_s5, 4294963200  ;;  %p3799_p11 = scmp.eq.s32.totalorder %s2875_s19, 0 }
  0x81   : > { %2791 = dma.done.wait (%p3799_p11), [#allocation6], 4096   ;;  %p3800_p8 = pmov %p3799_p11 }
  0x83   : > { %2793 = vsyncadd (%p3800_p8), [#allocation6], 4294963200  ;;  %p3801_p13 = pmov %p3800_p8 }
  0x84   : > { %p3802_p6 = pmov %p3800_p8 }
  0x85   : > { %2795 = dma.done.wait (%p3801_p13), [#allocation9], 256  }
  0x86   : > { %2797 = vsyncadd (%p3802_p6), [#allocation9], 4294967040  ;;  %vm332_vm0 = vcmask 261120   ;;  %v300_v1 = vld [vmem:[%s3062_s10] sm:$0xff]  ;;  %v301_v2 = vld [vmem:[%s3062_s10 + $0x8] sm:$0xff]  ;;  %vm1004_vm2 = vcmask 523264  }
  0x87   : > { %vm3078_vm1 = vmpackc.low %vm332_vm0, %vm332_vm0  ;;  %v302_v3 = vld [vmem:[%s3062_s10 + $0x10] sm:$0xff]  ;;  %v2319_v4 = vpack.c.bf16 %v301_v2, %v300_v1  ;;  %v3086_v5 = vld [vmem:[%s3062_s10 + $0x18] sm:$0xff]  ;;  %v316_v6 = vmul.f32 0.17677669, %v300_v1  ;;  %v317_v31 = vmul.f32 0.17677669, %v301_v2 }
  0x88   : > { %v2325_v7 = vpack.c.bf16 %v3086_v5, %v302_v3  ;;  %v304_v8 = vld [vmem:[%s3062_s10 + $0x20] sm:$0xff]  ;;  %v3098_v9 = vld [vmem:[%s3062_s10 + $0x28] sm:$0xff]  ;;  %v306_v11 = vld [vmem:[%s3062_s10 + $0x30] sm:$0xff]  ;;  %v318_v32 = vmul.f32 0.17677669, %v302_v3  ;;  %s3656_s21 = scalar_lea.vmem [#allocation10], %s1858_s24 }
  0x89   : > { %2321 = vmatprep.subr.msk.bf16.mxu0 %vm3078_vm1, %v2319_v4  ;;  %2135 = vmatprep.mubr.msk.f32.mxu0 %vm332_vm0, %v316_v6  ;;  %v2331_v10 = vpack.c.bf16 %v3098_v9, %v304_v8  ;;  %v3103_v12 = vld [vmem:[%s3062_s10 + $0x38] sm:$0xff]  ;;  %v308_v14 = vld [vmem:[%s3062_s10 + $0x40] sm:$0xff]  ;;  %v3112_v15 = vld [vmem:[%s3062_s10 + $0x48] sm:$0xff]  ;;  %v319_v34 = vmul.f32 0.17677669, %v3086_v5  ;;  %s1986_s23 = sshll.u32 %s2875_s19, 12 }
  0x8a   : > { %2324 = vmatpush3.bf16.xpose.msk.msra.mxu0 %vm3078_vm1, %v2319_v4  ;;  %2159 = vmatprep.subr.bf16.mxu1 %v2319_v4  ;;  %v2337_v13 = vpack.c.bf16 %v3103_v12, %v306_v11  ;;  %v2343_v16 = vpack.c.bf16 %v3112_v15, %v308_v14  ;;  %v310_v17 = vld [vmem:[%s3062_s10 + $0x50] sm:$0xff]  ;;  %v3117_v18 = vld [vmem:[%s3062_s10 + $0x58] sm:$0xff]  ;;  %v312_v20 = vld [vmem:[%s3062_s10 + $0x60] sm:$0xff]  ;;  %v320_v35 = vmul.f32 0.17677669, %v304_v8  ;;  %s1745_s14 = sshll.u32 %s3656_s21, 4  ;;  %s3729_s28 = scalar_lea.hbm %s3785_s4, %s1986_s23  ;;  %s3731_s14 = int_to_ptr.vmem [resolvable:$true] %s1745_s14 }
  0x8b   : > { %2327 = vmatprep.subr.msk.bf16.mxu0 %vm3078_vm1, %v2325_v7  ;;  %2160 = vmatpush3.bf16.msra.mxu1 %v2319_v4  ;;  %v2349_v19 = vpack.c.bf16 %v3117_v18, %v310_v17  ;;  %v3126_v21 = vld [vmem:[%s3062_s10 + $0x68] sm:$0xff]  ;;  %v3130_v23 = vld [vmem:[%s3062_s10 + $0x70] sm:$0xff]  ;;  %v3133_v24 = vld [vmem:[%s3062_s10 + $0x78] sm:$0xff]  ;;  %v321_v38 = vmul.f32 0.17677669, %v3098_v9  ;;  %s1731_s19 = scalar_lea.sflag [#allocation4], %s3056_s25 }
  0x8c   : > { %2161 = vmatprep.subr.bf16.mxu1 %v2325_v7  ;;  %v2355_v22 = vpack.c.bf16 %v3126_v21, %v312_v20  ;;  %v2361_v25 = vpack.c.bf16 %v3133_v24, %v3130_v23  ;;  %v1905_v26 = vld [vmem:[%s3062_s10 + $0x80] sm:$0xff]  ;;  %v3155_v27 = vld [vmem:[%s3062_s10 + $0x88] sm:$0xff]  ;;  %v3166_v29 = vld [vmem:[%s3062_s10 + $0x90] sm:$0xff]  ;;  %v322_v39 = vmul.f32 0.17677669, %v306_v11  ;;  %s2742_s11 = scalar_lea.vmem %s3731_s14, 4096 }
  0x8d   : > { %v3158_v28 = vpack.c.bf16 %v3155_v27, %v1905_v26  ;;  %v3169_v30 = vld [vmem:[%s3062_s10 + $0x98] sm:$0xff]  ;;  %v1909_v36 = vld [vmem:[%s3062_s10 + $0xa0] sm:$0xff]  ;;  %v3186_v37 = vld [vmem:[%s3062_s10 + $0xa8] sm:$0xff]  ;;  %v323_v41 = vmul.f32 0.17677669, %v3103_v12  ;;  %p2743_p10 = scmp.ne.s32.totalorder %s3731_s14, %s2742_s11  ;;  %s2826_s30 = smov [#allocation10]  }
  0x8e   : > { %v3173_v33 = vpack.c.bf16 %v3169_v30, %v3166_v29  ;;  %v3192_v40 = vpack.c.bf16 %v3186_v37, %v1909_v36  ;;  %v324_v42 = vmul.f32 0.17677669, %v308_v14  ;;  %v1911_v43 = vld [vmem:[%s3062_s10 + $0xb0] sm:$0xff]  ;;  %v1912_v44 = vld [vmem:[%s3062_s10 + $0xb8] sm:$0xff]  ;;  %v325_v45 = vmul.f32 0.17677669, %v3112_v15 }
  0x8f   : > { %2162 = vmatpush3.bf16.msra.mxu1 %v2325_v7  ;;  %v326_v46 = vmul.f32 0.17677669, %v310_v17  ;;  %v3208_v47 = vpack.c.bf16 %v1912_v44, %v1911_v43  ;;  %v327_v48 = vmul.f32 0.17677669, %v3117_v18  ;;  %v328_v49 = vmul.f32 0.17677669, %v312_v20  ;;  %p2744_p3 = pnand %p2743_p10, %p3005_p5 }
  0x90   : > { %2163 = vmatprep.subr.bf16.mxu1 %v2331_v10  ;;  %v1913_v50 = vld [vmem:[%s3062_s10 + $0xc0] sm:$0xff]  ;;  %v1914_v51 = vld [vmem:[%s3062_s10 + $0xc8] sm:$0xff]  ;;  %v329_v52 = vmul.f32 0.17677669, %v3126_v21  ;;  %v330_v53 = vmul.f32 0.17677669, %v3130_v23 }
  0x91   : > { %v3225_v54 = vpack.c.bf16 %v1914_v51, %v1913_v50  ;;  %v331_v55 = vmul.f32 0.17677669, %v3133_v24  ;;  %v1038_v56 = vmul.f32 0.17677669, %v1905_v26  ;;  %v1915_v57 = vld [vmem:[%s3062_s10 + $0xd0] sm:$0xff]  ;;  %v1916_v58 = vld [vmem:[%s3062_s10 + $0xd8] sm:$0xff]  ;;  %p2745_p7 = pneg %p2744_p3 }
  0x92   : > { %2330 = vmatpush3.bf16.xpose.msk.msra.mxu0 %vm3078_vm1, %v2325_v7  ;;  %v3240_v59 = vpack.c.bf16 %v1916_v58, %v1915_v57  ;;  %v1917_v60 = vld [vmem:[%s3062_s10 + $0xe0] sm:$0xff]  ;;  %v1918_v61 = vld [vmem:[%s3062_s10 + $0xe8] sm:$0xff]  ;;  %v1919_v63 = vld [vmem:[%s3062_s10 + $0xf0] sm:$0xff]  ;;  %v1039_v3 = vmul.f32 0.17677669, %v3155_v27  ;;  %s2746_s6 = sshll.u32 %s2826_s30, 4  ;;  %s2747_s6 = int_to_ptr.vmem [resolvable:$false] %s2746_s6 }
  0x93   : > { %2333 = vmatprep.subr.msk.bf16.mxu0 %vm3078_vm1, %v2331_v10  ;;  %2164 = vmatpush3.bf16.msra.mxu1 %v2331_v10  ;;  %v3250_v62 = vpack.c.bf16 %v1918_v61, %v1917_v60  ;;  %v1920_v1 = vld [vmem:[%s3062_s10 + $0xf8] sm:$0xff]  ;;  %v1040_v4 = vmul.f32 0.17677669, %v3166_v29  ;;  %v1041_v5 = vmul.f32 0.17677669, %v3169_v30  ;;  %v3290_v17 = vld [vmem:[#allocation7] sm:$0xff]  ;;  %p2749_p12 = scmp.lt.s32.totalorder %s3731_s14, %s2747_s6 }
  0x94   : > { %2165 = vmatprep.subr.bf16.mxu1 %v2337_v13  ;;  %v3260_v2 = vpack.c.bf16 %v1920_v1, %v1919_v63  ;;  %v1042_v6 = vmul.f32 0.17677669, %v1909_v36  ;;  %v1043_v7 = vmul.f32 0.17677669, %v3186_v37  ;;  %v1044_v8 = vmul.f32 0.17677669, %v1911_v43 }
  0x95   : > { %v1045_v0 = vmul.f32 0.17677669, %v1912_v44  ;;  %v1046_v9 = vmul.f32 0.17677669, %v1913_v50  ;;  %v1048_v11 = vmul.f32 0.17677669, %v1915_v57 }
  0x96   : > { %v1049_v12 = vmul.f32 0.17677669, %v1916_v58  ;;  %v1051_v14 = vmul.f32 0.17677669, %v1918_v61  ;;  %v1052_v15 = vmul.f32 0.17677669, %v1919_v63 }
  0x97   : > { %2166 = vmatpush3.bf16.msra.mxu1 %v2337_v13  ;;  %v3295_v21 = vld [vmem:[#allocation7 + $0x18] sm:$0xff]  ;;  %v282_v27 = vld [vmem:[#allocation7 + $0x10] sm:$0xff]  ;;  %v284_v29 = vld [vmem:[#allocation7 + $0x20] sm:$0xff]  ;;  %s2748_s26 = scalar_lea.vmem %s2747_s6, 8192 }
  0x98   : > { %2167 = vmatprep.subr.bf16.mxu1 %v2343_v16  ;;  %v285_v30 = vld [vmem:[#allocation7 + $0x28] sm:$0xff]  ;;  %v286_v37 = vld [vmem:[#allocation7 + $0x30] sm:$0xff]  ;;  %v288_v44 = vld [vmem:[#allocation7 + $0x40] sm:$0xff]  ;;  %p2750_p1 = scmp.lt.s32.totalorder %s2748_s26, %s2742_s11 }
  0x99   : > { %v292_v58 = vld [vmem:[#allocation7 + $0x60] sm:$0xff] }
  0x9a   : > { %2336 = vmatpush3.bf16.xpose.msk.msra.mxu0 %vm3078_vm1, %v2331_v10  ;;  %v1047_v10 = vmul.f32 0.17677669, %v1914_v51  ;;  %v290_v51 = vld [vmem:[#allocation7 + $0x50] sm:$0xff]  ;;  %p2751_p2 = por %p2750_p1, %p2749_p12 }
  0x9b   : > { %2339 = vmatprep.subr.msk.bf16.mxu0 %vm3078_vm1, %v2337_v13  ;;  %2168 = vmatpush3.bf16.msra.mxu1 %v2343_v16 }
  0x9c   : > { %2169 = vmatprep.subr.bf16.mxu1 %v2349_v19  ;;  %p2752_p4 = pnand %p2751_p2, %p2745_p7 }
  0x9f   : > { %2170 = vmatpush3.bf16.msra.mxu1 %v2349_v19 }
  0xa0   : > { %2171 = vmatprep.subr.bf16.mxu1 %v2355_v22 }
  0xa2   : > { %2342 = vmatpush3.bf16.xpose.msk.msra.mxu0 %vm3078_vm1, %v2337_v13  ;;  %v1050_v13 = vmul.f32 0.17677669, %v1917_v60  ;;  %v293_v60 = vld [vmem:[#allocation7 + $0x68] sm:$0xff] }
  0xa3   : > { %2345 = vmatprep.subr.msk.bf16.mxu0 %vm3078_vm1, %v2343_v16  ;;  %2172 = vmatpush3.bf16.msra.mxu1 %v2355_v22 }
  0xa4   : > { %2173 = vmatprep.subr.bf16.mxu1 %v2361_v25 }
  0xa7   : > { %2174 = vmatpush3.bf16.msra.mxu1 %v2361_v25 }
  0xaa   : > { %2348 = vmatpush3.bf16.xpose.msk.msra.mxu0 %vm3078_vm1, %v2343_v16  ;;  %v1053_v16 = vmul.f32 0.17677669, %v1920_v1 }
  0xab   : > { %2351 = vmatprep.subr.msk.bf16.mxu0 %vm3078_vm1, %v2349_v19 }
  0xb2   : > { %2354 = vmatpush3.bf16.xpose.msk.msra.mxu0 %vm3078_vm1, %v2349_v19 }
  0xb3   : > { %2357 = vmatprep.subr.msk.bf16.mxu0 %vm3078_vm1, %v2355_v22 }
  0xba   : > { %2360 = vmatpush3.bf16.xpose.msk.msra.mxu0 %vm3078_vm1, %v2355_v22  ;;  %v281_v22 = vld [vmem:[#allocation7 + $0x8] sm:$0xff] }
  0xbb   : > { %2363 = vmatprep.subr.msk.bf16.mxu0 %vm3078_vm1, %v2361_v25 }
  0xc2   : > { %2366 = vmatpush3.bf16.xpose.msk.msra.mxu0 %vm3078_vm1, %v2361_v25 }
  0xc3   : > { %2369 = vmatprep.subr.msk.bf16.mxu0 %vm3078_vm1, %v3158_v28 }
  0xc9   : > { %2136 = vmatmul.mubr.msk.f32.vlgmr.msra.gmra.mrb[0].mxu0 %vm332_vm0, %v317_v31 }
  0xca   : > { %2138 = vmatprep.mubr.msk.f32.mxu0 %vm332_vm0, %v318_v32  ;;  %2372 = vmatpush3.bf16.xpose.msk.msra.mxu0 %vm3078_vm1, %v3158_v28 }
  0xcb   : > { %2375 = vmatprep.subr.msk.bf16.mxu0 %vm3078_vm1, %v3173_v33 }
  0xcd   : > { %2139 = vmatmul.mubr.msk.f32.gmra.mrb[2].mxu0 %vm332_vm0, %v319_v34 }
  0xce   : > { %2141 = vmatprep.mubr.msk.f32.mxu0 %vm332_vm0, %v320_v35 }
  0xd1   : > { %2142 = vmatmul.mubr.msk.f32.gmra.mrb[4].mxu0 %vm332_vm0, %v321_v38  ;;  %v287_v38 = vld [vmem:[#allocation7 + $0x38] sm:$0xff] }
  0xd2   : > { %2144 = vmatprep.mubr.msk.f32.mxu0 %vm332_vm0, %v322_v39  ;;  %2378 = vmatpush3.bf16.xpose.msk.msra.mxu0 %vm3078_vm1, %v3173_v33 }
  0xd3   : > { %2381 = vmatprep.subr.msk.bf16.mxu0 %vm3078_vm1, %v3192_v40 }
  0xd5   : > { %2145 = vmatmul.mubr.msk.f32.gmra.mrb[6].mxu0 %vm332_vm0, %v323_v41 }
  0xd6   : > { %2147 = vmatprep.mubr.msk.f32.mxu0 %vm332_vm0, %v324_v42 }
  0xd9   : > { %2148 = vmatmul.mubr.msk.f32.gmra.mrb[8].mxu0 %vm332_vm0, %v325_v45  ;;  %v289_v45 = vld [vmem:[#allocation7 + $0x48] sm:$0xff] }
  0xda   : > { %2150 = vmatprep.mubr.msk.f32.mxu0 %vm332_vm0, %v326_v46  ;;  %2384 = vmatpush3.bf16.xpose.msk.msra.mxu0 %vm3078_vm1, %v3192_v40 }
  0xdb   : > { %2387 = vmatprep.subr.msk.bf16.mxu0 %vm3078_vm1, %v3208_v47 }
  0xdd   : > { %2151 = vmatmul.mubr.msk.f32.gmra.mrb[10].mxu0 %vm332_vm0, %v327_v48 }
  0xde   : > { %2153 = vmatprep.mubr.msk.f32.mxu0 %vm332_vm0, %v328_v49 }
  0xe1   : > { %2154 = vmatmul.mubr.msk.f32.gmra.mrb[12].mxu0 %vm332_vm0, %v329_v52  ;;  %v291_v52 = vld [vmem:[#allocation7 + $0x58] sm:$0xff] }
  0xe2   : > { %2156 = vmatprep.mubr.msk.f32.mxu0 %vm332_vm0, %v330_v53  ;;  %2390 = vmatpush3.bf16.xpose.msk.msra.mxu0 %vm3078_vm1, %v3208_v47 }
  0xe3   : > { %2393 = vmatprep.subr.msk.bf16.mxu0 %vm3078_vm1, %v3225_v54 }
  0xe5   : > { %2157 = vmatmul.mubr.msk.f32.gmra.mrb[14].mxu0 %vm332_vm0, %v331_v55 }
  0xe6   : > { %2243 = vmatprep.mubr.msk.f32.mxu0 %vm332_vm0, %v1038_v56 }
  0xea   : > { %2396 = vmatpush3.bf16.xpose.msk.msra.mxu0 %vm3078_vm1, %v3225_v54 }
  0xeb   : > { %2399 = vmatprep.subr.msk.bf16.mxu0 %vm3078_vm1, %v3240_v59 }
  0xf2   : > { %2402 = vmatpush3.bf16.xpose.msk.msra.mxu0 %vm3078_vm1, %v3240_v59 }
  0xf3   : > { %2405 = vmatprep.subr.msk.bf16.mxu0 %vm3078_vm1, %v3250_v62 }
  0xfa   : > { %2408 = vmatpush3.bf16.xpose.msk.msra.mxu0 %vm3078_vm1, %v3250_v62 }
  0xfb   : > { %2411 = vmatprep.subr.msk.bf16.mxu0 %vm3078_vm1, %v3260_v2 }
 0x102   : > { %2414 = vmatpush3.bf16.xpose.msk.msra.mxu0 %vm3078_vm1, %v3260_v2 }
 0x109   : > { %2244 = vmatmul.mubr.msk.f32.vlgmr.msra.gmra.mrb[16].mxu0 %vm332_vm0, %v1039_v3 }
 0x10a   : > { %2246 = vmatprep.mubr.msk.f32.mxu0 %vm332_vm0, %v1040_v4  ;;  %v294_v4 = vld [vmem:[#allocation7 + $0x70] sm:$0xff] }
 0x10d   : > { %2247 = vmatmul.mubr.msk.f32.gmra.mrb[18].mxu0 %vm332_vm0, %v1041_v5  ;;  %v295_v5 = vld [vmem:[#allocation7 + $0x78] sm:$0xff] }
 0x10e   : > { %2249 = vmatprep.mubr.msk.f32.mxu0 %vm332_vm0, %v1042_v6 }
 0x111   : > { %2250 = vmatmul.mubr.msk.f32.gmra.mrb[20].mxu0 %vm332_vm0, %v1043_v7 }
 0x112   : > { %2252 = vmatprep.mubr.msk.f32.mxu0 %vm332_vm0, %v1044_v8 }
 0x115   : > { %2253 = vmatmul.mubr.msk.f32.gmra.mrb[22].mxu0 %vm332_vm0, %v1045_v0 }
 0x116   : > { %2255 = vmatprep.mubr.msk.f32.mxu0 %vm332_vm0, %v1046_v9 }
 0x119   : > { %2256 = vmatmul.mubr.msk.f32.gmra.mrb[24].mxu0 %vm332_vm0, %v1047_v10 }
 0x11a   : > { %2258 = vmatprep.mubr.msk.f32.mxu0 %vm332_vm0, %v1048_v11 }
 0x11d   : > { %2259 = vmatmul.mubr.msk.f32.gmra.mrb[26].mxu0 %vm332_vm0, %v1049_v12 }
 0x11e   : > { %2261 = vmatprep.mubr.msk.f32.mxu0 %vm332_vm0, %v1050_v13 }
 0x121   : > { %2262 = vmatmul.mubr.msk.f32.gmra.mrb[28].mxu0 %vm332_vm0, %v1051_v14 }
 0x122   : > { %2264 = vmatprep.mubr.msk.f32.mxu0 %vm332_vm0, %v1052_v15 }
 0x125   : > { %2265 = vmatmul.mubr.msk.f32.gmra.mrb[30].mxu0 %vm332_vm0, %v1053_v16 }
 0x19c   : > { %v2137_v18 = vpop.f32.mrb[0].mxu0 }
 0x19d   : > { %v495_v19 = vpop.f32.mrb[1].mxu0  ;;  %v3301_v26 = vadd.f32 %v2137_v18, %v281_v22 }
 0x19e   : > { %v3293_v20 = vadd.f32 %v495_v19, %v3290_v17 }
 0x1a0   : > { %v2140_v23 = vpop.f32.mrb[2].mxu0  ;;  %574 = vmax.xlane.f32.xlu0 %v3293_v20 }
 0x1a1   : > { %v3299_v24 = vadd.f32 %v2140_v23, %v3295_v21  ;;  %v505_v25 = vpop.f32.mrb[3].mxu0 }
 0x1a2   : > { %v3305_v32 = vadd.f32 %v505_v25, %v282_v27 }
 0x1a3   : > { %580 = vmax.xlane.f32.xlu1 %v3299_v24 }
 0x1a4   : > { %v2143_v31 = vpop.f32.mrb[4].mxu0  ;;  %576 = vmax.xlane.f32.xlu0 %v3301_v26 }
 0x1a5   : > { %v515_v34 = vpop.f32.mrb[5].mxu0  ;;  %v3309_v36 = vadd.f32 %v2143_v31, %v285_v30 }
 0x1a6   : > { %v3307_v35 = vadd.f32 %v515_v34, %v284_v29 }
 0x1a7   : > { %578 = vmax.xlane.f32.xlu1 %v3305_v32 }
 0x1a8   : > { %v2146_v39 = vpop.f32.mrb[6].mxu0  ;;  %582 = vmax.xlane.f32.xlu0 %v3307_v35 }
 0x1a9   : > { %v525_v41 = vpop.f32.mrb[7].mxu0  ;;  %v3315_v43 = vadd.f32 %v2146_v39, %v287_v38 }
 0x1aa   : > { %v3313_v42 = vadd.f32 %v525_v41, %v286_v37 }
 0x1ab   : > { %584 = vmax.xlane.f32.xlu1 %v3309_v36 }
 0x1ac   : > { %v2149_v46 = vpop.f32.mrb[8].mxu0  ;;  %586 = vmax.xlane.f32.xlu0 %v3313_v42 }
 0x1ad   : > { %v535_v48 = vpop.f32.mrb[9].mxu0  ;;  %v3321_v50 = vadd.f32 %v2149_v46, %v289_v45 }
 0x1ae   : > { %v3319_v49 = vadd.f32 %v535_v48, %v288_v44 }
 0x1af   : > { %588 = vmax.xlane.f32.xlu1 %v3315_v43 }
 0x1b0   : > { %v2152_v53 = vpop.f32.mrb[10].mxu0  ;;  %590 = vmax.xlane.f32.xlu0 %v3319_v49 }
 0x1b1   : > { %v545_v55 = vpop.f32.mrb[11].mxu0  ;;  %v3327_v57 = vadd.f32 %v2152_v53, %v291_v52 }
 0x1b2   : > { %v3325_v56 = vadd.f32 %v545_v55, %v290_v51 }
 0x1b3   : > { %592 = vmax.xlane.f32.xlu1 %v3321_v50 }
 0x1b4   : > { %v2155_v61 = vpop.f32.mrb[12].mxu0  ;;  %594 = vmax.xlane.f32.xlu0 %v3325_v56 }
 0x1b5   : > { %v555_v63 = vpop.f32.mrb[13].mxu0  ;;  %v3333_v3 = vadd.f32 %v2155_v61, %v293_v60 }
 0x1b6   : > { %v3331_v1 = vadd.f32 %v555_v63, %v292_v58 }
 0x1b7   : > { %596 = vmax.xlane.f32.xlu1 %v3327_v57 }
 0x1b8   : > { %v2158_v6 = vpop.f32.mrb[14].mxu0  ;;  %598 = vmax.xlane.f32.xlu0 %v3331_v1 }
 0x1b9   : > { %v565_v7 = vpop.f32.mrb[15].mxu0  ;;  %v3339_v0 = vadd.f32 %v2158_v6, %v295_v5 }
 0x1ba   : > { %v3337_v8 = vadd.f32 %v565_v7, %v294_v4 }
 0x1bb   : > { %600 = vmax.xlane.f32.xlu1 %v3333_v3 }
 0x1bc   : > { %602 = vmax.xlane.f32.xlu0 %v3337_v8 }
 0x1bf   : > { %604 = vmax.xlane.f32.xlu1 %v3339_v0 }
 0x1dc   : > { %v2245_v9 = vpop.f32.mrb[16].mxu0 }
 0x1dd   : > { %v3344_v10 = vadd.f32 %v2245_v9, %v281_v22  ;;  %v1216_v11 = vpop.f32.mrb[17].mxu0 }
 0x1de   : > { %v3347_v12 = vadd.f32 %v1216_v11, %v3290_v17 }
 0x1e0   : > { %v2248_v13 = vpop.f32.mrb[18].mxu0 }
 0x1e1   : > { %v3350_v14 = vadd.f32 %v2248_v13, %v3295_v21  ;;  %v1226_v15 = vpop.f32.mrb[19].mxu0 }
 0x1e2   : > { %v3352_v16 = vadd.f32 %v1226_v15, %v282_v27 }
 0x1e4   : > { %v2251_v18 = vpop.f32.mrb[20].mxu0 }
 0x1e5   : > { %v3354_v19 = vadd.f32 %v2251_v18, %v285_v30  ;;  %v1236_v23 = vpop.f32.mrb[21].mxu0 }
 0x1e6   : > { %v3356_v25 = vadd.f32 %v1236_v23, %v284_v29 }
 0x1e8   : > { %v2254_v31 = vpop.f32.mrb[22].mxu0 }
 0x1e9   : > { %v3358_v22 = vadd.f32 %v2254_v31, %v287_v38  ;;  %v1246_v34 = vpop.f32.mrb[23].mxu0 }
 0x1ea   : > { %v3360_v39 = vadd.f32 %v1246_v34, %v286_v37 }
 0x1ec   : > { %v2257_v17 = vpop.f32.mrb[24].mxu0 }
 0x1ed   : > { %v3362_v41 = vadd.f32 %v2257_v17, %v289_v45  ;;  %v1256_v21 = vpop.f32.mrb[25].mxu0 }
 0x1ee   : > { %v3364_v46 = vadd.f32 %v1256_v21, %v288_v44 }
 0x1f0   : > { %v2260_v27 = vpop.f32.mrb[26].mxu0 }
 0x1f1   : > { %v3366_v48 = vadd.f32 %v2260_v27, %v291_v52  ;;  %v1266_v30 = vpop.f32.mrb[27].mxu0 }
 0x1f2   : > { %v3368_v53 = vadd.f32 %v1266_v30, %v290_v51 }
 0x1f4   : > { %v2263_v29 = vpop.f32.mrb[28].mxu0 }
 0x1f5   : > { %v3370_v55 = vadd.f32 %v2263_v29, %v293_v60  ;;  %v1276_v38 = vpop.f32.mrb[29].mxu0 }
 0x1f6   : > { %v3372_v61 = vadd.f32 %v1276_v38, %v292_v58 }
 0x1f8   : > { %v2266_v37 = vpop.f32.mrb[30].mxu0 }
 0x1f9   : > { %v3374_v63 = vadd.f32 %v2266_v37, %v295_v5  ;;  %v1286_v45 = vpop.f32.mrb[31].mxu0 }
 0x1fa   : > { %v3376_v6 = vadd.f32 %v1286_v45, %v294_v4 }
 0x22d   : > { %v575_v44 = vpop.xlane.xlu0 %574 }
 0x22e   : > { %v606_v7 = vsub.f32 %v3293_v20, %v575_v44 }
 0x230   : > { %v622_v52 = vmul.f32 1.442695, %v606_v7  ;;  %v581_v9 = vpop.xlane.xlu1 %580 }
 0x231   : > { %v577_v11 = vpop.xlane.xlu0 %576  ;;  %v609_v51 = vsub.f32 %v3299_v24, %v581_v9 }
 0x232   : > { %2500 = vpow2.f32 %v622_v52  ;;  %v607_v60 = vsub.f32 %v3301_v26, %v577_v11 }
 0x233   : > { %v628_v18 = vmul.f32 1.442695, %v609_v51 }
 0x234   : > { %v624_v13 = vmul.f32 1.442695, %v607_v60  ;;  %v579_v58 = vpop.xlane.xlu1 %578 }
 0x235   : > { %v608_v15 = vsub.f32 %v3305_v32, %v579_v58  ;;  %v583_v5 = vpop.xlane.xlu0 %582 }
 0x236   : > { %2502 = vpow2.f32 %v624_v13  ;;  %v610_v4 = vsub.f32 %v3307_v35, %v583_v5 }
 0x237   : > { %v626_v23 = vmul.f32 1.442695, %v608_v15 }
 0x238   : > { %v630_v31 = vmul.f32 1.442695, %v610_v4  ;;  %v585_v20 = vpop.xlane.xlu1 %584 }
 0x239   : > { %2504 = vpow2.f32 %v626_v23  ;;  %v611_v34 = vsub.f32 %v3309_v36, %v585_v20  ;;  %v587_v17 = vpop.xlane.xlu0 %586 }
 0x23a   : > { %2506 = vpow2.f32 %v628_v18  ;;  %v612_v24 = vsub.f32 %v3313_v42, %v587_v17 }
 0x23b   : > { %v632_v26 = vmul.f32 1.442695, %v611_v34  ;;  %2508 = vpow2.f32 %v630_v31 }
 0x23c   : > { %v3385_v21 = vpop.eup %2500  ;;  %v634_v32 = vmul.f32 1.442695, %v612_v24  ;;  %v589_v27 = vpop.xlane.xlu1 %588 }
 0x23d   : > { %2510 = vpow2.f32 %v632_v26  ;;  %v613_v30 = vsub.f32 %v3315_v43, %v589_v27  ;;  %654 = vadd.xlane.f32.xlu0 %v3385_v21  ;;  %v591_v35 = vpop.xlane.xlu0 %590 }
 0x23e   : > { %v614_v29 = vsub.f32 %v3319_v49, %v591_v35  ;;  %2512 = vpow2.f32 %v634_v32 }
 0x23f   : > { %v636_v38 = vmul.f32 1.442695, %v613_v30 }
 0x240   : > { %v3390_v36 = vpop.eup %2502  ;;  %v638_v37 = vmul.f32 1.442695, %v614_v29  ;;  %v593_v42 = vpop.xlane.xlu1 %592 }
 0x241   : > { %2514 = vpow2.f32 %v636_v38  ;;  %v615_v45 = vsub.f32 %v3321_v50, %v593_v42  ;;  %656 = vadd.xlane.f32.xlu1 %v3390_v36  ;;  %v595_v44 = vpop.xlane.xlu0 %594 }
 0x242   : > { %v616_v7 = vsub.f32 %v3325_v56, %v595_v44  ;;  %2516 = vpow2.f32 %v638_v37 }
 0x243   : > { %v3395_v43 = vpop.eup %2504  ;;  %v640_v52 = vmul.f32 1.442695, %v615_v45 }
 0x244   : > { %v3397_v9 = vpop.eup %2506  ;;  %v642_v49 = vmul.f32 1.442695, %v616_v7  ;;  %v597_v11 = vpop.xlane.xlu1 %596  ;;  %658 = vadd.xlane.f32.xlu0 %v3395_v43 }
 0x245   : > { %2518 = vpow2.f32 %v640_v52  ;;  %v617_v51 = vsub.f32 %v3327_v57, %v597_v11  ;;  %660 = vadd.xlane.f32.xlu1 %v3397_v9  ;;  %v599_v50 = vpop.xlane.xlu0 %598  ;;  %v3402_v60 = vpop.eup %2508 }
 0x246   : > { %v618_v56 = vsub.f32 %v3331_v1, %v599_v50  ;;  %2520 = vpow2.f32 %v642_v49  ;;  %v3461_v50 = vld [vmem:[#allocation5 + $0x8] sm:$0xff] }
 0x247   : > { %v3405_v13 = vpop.eup %2510  ;;  %v644_v58 = vmul.f32 1.442695, %v617_v51  ;;  %v3459_v51 = vld [vmem:[#allocation5] sm:$0xff] }
 0x248   : > { %v646_v15 = vmul.f32 1.442695, %v618_v56  ;;  %v601_v5 = vpop.xlane.xlu1 %600  ;;  %662 = vadd.xlane.f32.xlu0 %v3402_v60  ;;  %v3410_v4 = vpop.eup %2512 }
 0x249   : > { %2522 = vpow2.f32 %v644_v58  ;;  %v619_v18 = vsub.f32 %v3333_v3, %v601_v5  ;;  %664 = vadd.xlane.f32.xlu1 %v3405_v13  ;;  %v603_v57 = vpop.xlane.xlu0 %602 }
 0x24a   : > { %v620_v23 = vsub.f32 %v3337_v8, %v603_v57  ;;  %2524 = vpow2.f32 %v646_v15  ;;  %v3466_v57 = vld [vmem:[#allocation5 + $0x10] sm:$0xff] }
 0x24b   : > { %v3413_v31 = vpop.eup %2514  ;;  %v648_v1 = vmul.f32 1.442695, %v619_v18 }
 0x24c   : > { %v650_v20 = vmul.f32 1.442695, %v620_v23  ;;  %v605_v34 = vpop.xlane.xlu1 %604  ;;  %666 = vadd.xlane.f32.xlu0 %v3410_v4  ;;  %v3418_v3 = vpop.eup %2516 }
 0x24d   : > { %2526 = vpow2.f32 %v648_v1  ;;  %v621_v17 = vsub.f32 %v3339_v0, %v605_v34  ;;  %668 = vadd.xlane.f32.xlu1 %v3413_v31  ;;  %v3468_v1 = vld [vmem:[#allocation5 + $0x18] sm:$0xff] }
 0x24e   : > { %2528 = vpow2.f32 %v650_v20 }
 0x24f   : > { %v3420_v24 = vpop.eup %2518  ;;  %v652_v26 = vmul.f32 1.442695, %v621_v17 }
 0x250   : > { %670 = vadd.xlane.f32.xlu0 %v3418_v3  ;;  %v3424_v8 = vpop.eup %2520 }
 0x251   : > { %2530 = vpow2.f32 %v652_v26  ;;  %672 = vadd.xlane.f32.xlu1 %v3420_v24 }
 0x253   : > { %v3426_v32 = vpop.eup %2522 }
 0x254   : > { %674 = vadd.xlane.f32.xlu0 %v3424_v8  ;;  %v3430_v0 = vpop.eup %2524 }
 0x255   : > { %676 = vadd.xlane.f32.xlu1 %v3426_v32 }
 0x257   : > { %v3432_v27 = vpop.eup %2526 }
 0x258   : > { %678 = vadd.xlane.f32.xlu0 %v3430_v0  ;;  %v3436_v30 = vpop.eup %2528 }
 0x259   : > { %680 = vadd.xlane.f32.xlu1 %v3432_v27 }
 0x25b   : > { %v3438_v35 = vpop.eup %2530 }
 0x25c   : > { %682 = vadd.xlane.f32.xlu0 %v3436_v30 }
 0x25d   : > { %684 = vadd.xlane.f32.xlu1 %v3438_v35 }
 0x260   : > { %1295 = vmax.xlane.f32.xlu0 %v3347_v12 }
 0x261   : > { %1297 = vmax.xlane.f32.xlu1 %v3344_v10 }
 0x264   : > { %1299 = vmax.xlane.f32.xlu0 %v3352_v16 }
 0x265   : > { %1301 = vmax.xlane.f32.xlu1 %v3350_v14 }
 0x268   : > { %1303 = vmax.xlane.f32.xlu0 %v3356_v25 }
 0x269   : > { %1305 = vmax.xlane.f32.xlu1 %v3354_v19 }
 0x26c   : > { %1307 = vmax.xlane.f32.xlu0 %v3360_v39 }
 0x26d   : > { %1309 = vmax.xlane.f32.xlu1 %v3358_v22 }
 0x270   : > { %1311 = vmax.xlane.f32.xlu0 %v3364_v46 }
 0x271   : > { %1313 = vmax.xlane.f32.xlu1 %v3362_v41 }
 0x274   : > { %1315 = vmax.xlane.f32.xlu0 %v3368_v53 }
 0x275   : > { %1317 = vmax.xlane.f32.xlu1 %v3366_v48 }
 0x278   : > { %1319 = vmax.xlane.f32.xlu0 %v3372_v61 }
 0x279   : > { %1321 = vmax.xlane.f32.xlu1 %v3370_v55 }
 0x27c   : > { %1323 = vmax.xlane.f32.xlu0 %v3376_v6 }
 0x27d   : > { %1325 = vmax.xlane.f32.xlu1 %v3374_v63 }
 0x2ca   : > { %v655_v29 = vpop.xlane.xlu0 %654 }
 0x2cb   : > { %2532 = vrcp.f32 %v655_v29 }
 0x2ce   : > { %v657_v38 = vpop.xlane.xlu1 %656 }
 0x2cf   : > { %2534 = vrcp.f32 %v657_v38 }
 0x2d1   : > { %v659_v37 = vpop.xlane.xlu0 %658 }
 0x2d2   : > { %2536 = vrcp.f32 %v659_v37  ;;  %v661_v42 = vpop.xlane.xlu1 %660  ;;  %v3474_v37 = vld [vmem:[#allocation5 + $0x20] sm:$0xff] }
 0x2d3   : > { %2538 = vrcp.f32 %v661_v42 }
 0x2d5   : > { %v2533_v45 = vpop.eup %2532  ;;  %v663_v44 = vpop.xlane.xlu0 %662 }
 0x2d6   : > { %2540 = vrcp.f32 %v663_v44  ;;  %v665_v7 = vpop.xlane.xlu1 %664  ;;  %v702_v52 = vmul.f32 %v2533_v45, %v3385_v21  ;;  %v3476_v44 = vld [vmem:[#allocation5 + $0x28] sm:$0xff] }
 0x2d7   : > { %2542 = vrcp.f32 %v665_v7 }
 0x2d8   : > { %v718_v5 = vmul.f32 %v702_v52, %v3459_v51 }
 0x2d9   : > { %v2535_v49 = vpop.eup %2534  ;;  %v667_v11 = vpop.xlane.xlu0 %666 }
 0x2da   : > { %2544 = vrcp.f32 %v667_v11  ;;  %v669_v56 = vpop.xlane.xlu1 %668  ;;  %v703_v58 = vmul.f32 %v2535_v49, %v3390_v36 }
 0x2db   : > { %2546 = vrcp.f32 %v669_v56 }
 0x2dc   : > { %v2537_v15 = vpop.eup %2536  ;;  %v719_v18 = vmul.f32 %v703_v58, %v3461_v50  ;;  %v3482_v58 = vld [vmem:[#allocation5 + $0x30] sm:$0xff] }
 0x2dd   : > { %v2539_v23 = vpop.eup %2538  ;;  %v671_v21 = vpop.xlane.xlu0 %670  ;;  %v704_v20 = vmul.f32 %v2537_v15, %v3395_v43 }
 0x2de   : > { %2548 = vrcp.f32 %v671_v21  ;;  %v673_v34 = vpop.xlane.xlu1 %672  ;;  %v734_v17 = vpack.c.bf16 %v719_v18, %v718_v5  ;;  %v705_v26 = vmul.f32 %v2539_v23, %v3397_v9  ;;  %v3484_v18 = vld [vmem:[#allocation5 + $0x38] sm:$0xff] }
 0x2df   : > { %2550 = vrcp.f32 %v673_v34  ;;  %v720_v36 = vmul.f32 %v704_v20, %v3466_v57 }
 0x2e0   : > { %v2541_v29 = vpop.eup %2540  ;;  %2175 = vmatprep.mubr.bf16.mxu1 %v734_v17  ;;  %v721_v38 = vmul.f32 %v705_v26, %v3468_v1  ;;  %v3490_v26 = vld [vmem:[#allocation5 + $0x40] sm:$0xff] }
 0x2e1   : > { %v2543_v42 = vpop.eup %2542  ;;  %v675_v45 = vpop.xlane.xlu0 %674  ;;  %v706_v43 = vmul.f32 %v2541_v29, %v3402_v60 }
 0x2e2   : > { %2552 = vrcp.f32 %v675_v45  ;;  %v677_v7 = vpop.xlane.xlu1 %676  ;;  %v735_v52 = vpack.c.bf16 %v721_v38, %v720_v36  ;;  %v707_v9 = vmul.f32 %v2543_v42, %v3405_v13  ;;  %v3492_v38 = vld [vmem:[#allocation5 + $0x48] sm:$0xff] }
 0x2e3   : > { %2554 = vrcp.f32 %v677_v7  ;;  %v722_v49 = vmul.f32 %v706_v43, %v3474_v37 }
 0x2e4   : > { %v2545_v11 = vpop.eup %2544  ;;  %2176 = vmatmul.mubr.bf16.vlgmr.msra.gmra.mrb[0].mxu1 %v735_v52  ;;  %v723_v56 = vmul.f32 %v707_v9, %v3476_v44  ;;  %v3498_v9 = vld [vmem:[#allocation5 + $0x50] sm:$0xff] }
 0x2e5   : > { %v2547_v15 = vpop.eup %2546  ;;  %v679_v5 = vpop.xlane.xlu0 %678  ;;  %v708_v60 = vmul.f32 %v2545_v11, %v3410_v4 }
 0x2e6   : > { %2556 = vrcp.f32 %v679_v5  ;;  %v681_v23 = vpop.xlane.xlu1 %680  ;;  %v736_v21 = vpack.c.bf16 %v723_v56, %v722_v49  ;;  %v709_v13 = vmul.f32 %v2547_v15, %v3413_v31  ;;  %v3500_v56 = vld [vmem:[#allocation5 + $0x58] sm:$0xff] }
 0x2e7   : > { %2558 = vrcp.f32 %v681_v23  ;;  %v724_v20 = vmul.f32 %v708_v60, %v3482_v58 }
 0x2e8   : > { %v2549_v34 = vpop.eup %2548  ;;  %2179 = vmatprep.mubr.bf16.mxu1 %v736_v21  ;;  %v725_v17 = vmul.f32 %v709_v13, %v3484_v18 }
 0x2e9   : > { %v2551_v36 = vpop.eup %2550  ;;  %v683_v29 = vpop.xlane.xlu0 %682  ;;  %v710_v4 = vmul.f32 %v2549_v34, %v3418_v3 }
 0x2ea   : > { %2560 = vrcp.f32 %v683_v29  ;;  %v685_v42 = vpop.xlane.xlu1 %684  ;;  %v737_v45 = vpack.c.bf16 %v725_v17, %v724_v20  ;;  %v711_v31 = vmul.f32 %v2551_v36, %v3420_v24  ;;  %v3508_v17 = vld [vmem:[#allocation5 + $0x60] sm:$0xff] }
 0x2eb   : > { %2562 = vrcp.f32 %v685_v42  ;;  %v726_v43 = vmul.f32 %v710_v4, %v3490_v26  ;;  %v3510_v4 = vld [vmem:[#allocation5 + $0x68] sm:$0xff] }
 0x2ec   : > { %v2553_v7 = vpop.eup %2552  ;;  %2180 = vmatmul.mubr.bf16.gmra.mrb[4].mxu1 %v737_v45  ;;  %v727_v52 = vmul.f32 %v711_v31, %v3492_v38 }
 0x2ed   : > { %v2555_v49 = vpop.eup %2554  ;;  %v1296_v11 = vpop.xlane.xlu0 %1295  ;;  %v712_v3 = vmul.f32 %v2553_v7, %v3424_v8 }
 0x2ee   : > { %v1327_v15 = vsub.f32 %v3347_v12, %v1296_v11  ;;  %v1298_v5 = vpop.xlane.xlu1 %1297  ;;  %v738_v60 = vpack.c.bf16 %v727_v52, %v726_v43  ;;  %v713_v24 = vmul.f32 %v2555_v49, %v3426_v32  ;;  %v3518_v11 = vld [vmem:[#allocation5 + $0x70] sm:$0xff] }
 0x2ef   : > { %v1328_v23 = vsub.f32 %v3344_v10, %v1298_v5  ;;  %v728_v21 = vmul.f32 %v712_v3, %v3498_v9 }
 0x2f0   : > { %v2557_v13 = vpop.eup %2556  ;;  %v1343_v20 = vmul.f32 1.442695, %v1327_v15  ;;  %2183 = vmatprep.mubr.bf16.mxu1 %v738_v60  ;;  %v729_v34 = vmul.f32 %v713_v24, %v3500_v56 }
 0x2f1   : > { %v2559_v36 = vpop.eup %2558  ;;  %v1345_v29 = vmul.f32 1.442695, %v1328_v23  ;;  %v1300_v8 = vpop.xlane.xlu0 %1299  ;;  %v714_v12 = vmul.f32 %v2557_v13, %v3430_v0 }
 0x2f2   : > { %2564 = vpow2.f32 %v1343_v20  ;;  %v1329_v32 = vsub.f32 %v3352_v16, %v1300_v8  ;;  %v1302_v10 = vpop.xlane.xlu1 %1301  ;;  %v739_v42 = vpack.c.bf16 %v729_v34, %v728_v21  ;;  %v715_v45 = vmul.f32 %v2559_v36, %v3432_v27  ;;  %v3520_v16 = vld [vmem:[#allocation5 + $0x78] sm:$0xff] }
 0x2f3   : > { %2566 = vpow2.f32 %v1345_v29  ;;  %v1330_v31 = vsub.f32 %v3350_v14, %v1302_v10  ;;  %v730_v43 = vmul.f32 %v714_v12, %v3508_v17 }
 0x2f4   : > { %v2561_v7 = vpop.eup %2560  ;;  %v1347_v52 = vmul.f32 1.442695, %v1329_v32  ;;  %2184 = vmatmul.mubr.bf16.gmra.mrb[8].mxu1 %v739_v42  ;;  %v731_v49 = vmul.f32 %v715_v45, %v3510_v4 }
 0x2f5   : > { %v2563_v0 = vpop.eup %2562  ;;  %v1349_v3 = vmul.f32 1.442695, %v1330_v31  ;;  %v1304_v15 = vpop.xlane.xlu0 %1303  ;;  %v716_v5 = vmul.f32 %v2561_v7, %v3436_v30 }
 0x2f6   : > { %2568 = vpow2.f32 %v1347_v52  ;;  %v1331_v27 = vsub.f32 %v3356_v25, %v1304_v15  ;;  %v1306_v14 = vpop.xlane.xlu1 %1305  ;;  %v740_v60 = vpack.c.bf16 %v731_v49, %v730_v43  ;;  %v717_v24 = vmul.f32 %v2563_v0, %v3438_v35 }
 0x2f7   : > { %2570 = vpow2.f32 %v1349_v3  ;;  %v1332_v23 = vsub.f32 %v3354_v19, %v1306_v14  ;;  %v732_v21 = vmul.f32 %v716_v5, %v3518_v11 }
 0x2f8   : > { %v1351_v13 = vmul.f32 1.442695, %v1331_v27  ;;  %2187 = vmatprep.mubr.bf16.mxu1 %v740_v60  ;;  %v733_v20 = vmul.f32 %v717_v24, %v3520_v16 }
 0x2f9   : > { %v1353_v34 = vmul.f32 1.442695, %v1332_v23  ;;  %v1308_v36 = vpop.xlane.xlu0 %1307 }
 0x2fa   : > { %2572 = vpow2.f32 %v1351_v13  ;;  %v1333_v30 = vsub.f32 %v3360_v39, %v1308_v36  ;;  %v1310_v29 = vpop.xlane.xlu1 %1309  ;;  %v741_v25 = vpack.c.bf16 %v733_v20, %v732_v21 }
 0x2fb   : > { %2574 = vpow2.f32 %v1353_v34  ;;  %v1334_v8 = vsub.f32 %v3358_v22, %v1310_v29 }
 0x2fc   : > { %v3530_v35 = vpop.eup %2564  ;;  %v1355_v12 = vmul.f32 1.442695, %v1333_v30  ;;  %2188 = vmatmul.mubr.bf16.gmra.mrb[12].mxu1 %v741_v25 }
 0x2fd   : > { %v3532_v19 = vpop.eup %2566  ;;  %v1357_v32 = vmul.f32 1.442695, %v1334_v8  ;;  %1375 = vadd.xlane.f32.xlu0 %v3530_v35  ;;  %v1312_v10 = vpop.xlane.xlu0 %1311 }
 0x2fe   : > { %2576 = vpow2.f32 %v1355_v12  ;;  %v1335_v42 = vsub.f32 %v3364_v46, %v1312_v10  ;;  %1377 = vadd.xlane.f32.xlu1 %v3532_v19  ;;  %v1314_v39 = vpop.xlane.xlu1 %1313  ;;  %v3586_v10 = vld [vmem:[#allocation8] sm:$0xff]  }
 0x2ff   : > { %2578 = vpow2.f32 %v1357_v32  ;;  %v1336_v45 = vsub.f32 %v3362_v41, %v1314_v39  ;;  %2191 = vmatprep.subr.bf16.mxu1 %v3586_v10 }
 0x300   : > { %v3538_v22 = vpop.eup %2568  ;;  %v1359_v31 = vmul.f32 1.442695, %v1335_v42  ;;  %2192 = vmatpush3.bf16.msra.mxu1 %v3586_v10  ;;  %v3590_v42 = vld [vmem:[#allocation8 + $0x8] sm:$0xff]  }
 0x301   : > { %v3540_v43 = vpop.eup %2570  ;;  %v1361_v7 = vmul.f32 1.442695, %v1336_v45  ;;  %1379 = vadd.xlane.f32.xlu0 %v3538_v22  ;;  %v1316_v52 = vpop.xlane.xlu0 %1315  ;;  %2193 = vmatprep.subr.bf16.mxu1 %v3590_v42 }
 0x302   : > { %2580 = vpow2.f32 %v1359_v31  ;;  %v1337_v49 = vsub.f32 %v3368_v53, %v1316_v52  ;;  %1381 = vadd.xlane.f32.xlu1 %v3540_v43  ;;  %v1318_v46 = vpop.xlane.xlu1 %1317 }
 0x303   : > { %2582 = vpow2.f32 %v1361_v7  ;;  %v1338_v0 = vsub.f32 %v3366_v48, %v1318_v46 }
 0x304   : > { %v3546_v3 = vpop.eup %2572  ;;  %v1363_v41 = vmul.f32 1.442695, %v1337_v49  ;;  %2194 = vmatpush3.bf16.msra.mxu1 %v3590_v42 }
 0x305   : > { %v3548_v15 = vpop.eup %2574  ;;  %v1365_v5 = vmul.f32 1.442695, %v1338_v0  ;;  %1383 = vadd.xlane.f32.xlu0 %v3546_v3  ;;  %v1320_v27 = vpop.xlane.xlu0 %1319  ;;  %2267 = vmatprep.subr.bf16.mxu1 %v3158_v28 }
 0x306   : > { %2584 = vpow2.f32 %v1363_v41  ;;  %v1339_v14 = vsub.f32 %v3372_v61, %v1320_v27  ;;  %1385 = vadd.xlane.f32.xlu1 %v3548_v15  ;;  %v1322_v53 = vpop.xlane.xlu1 %1321 }
 0x307   : > { %2586 = vpow2.f32 %v1365_v5  ;;  %v1340_v60 = vsub.f32 %v3370_v55, %v1322_v53 }
 0x308   : > { %v3554_v24 = vpop.eup %2576  ;;  %v1367_v48 = vmul.f32 1.442695, %v1339_v14 }
 0x309   : > { %v3556_v23 = vpop.eup %2578  ;;  %v1369_v21 = vmul.f32 1.442695, %v1340_v60  ;;  %1387 = vadd.xlane.f32.xlu0 %v3554_v24  ;;  %v1324_v13 = vpop.xlane.xlu0 %1323 }
 0x30a   : > { %2588 = vpow2.f32 %v1367_v48  ;;  %v1341_v20 = vsub.f32 %v3376_v6, %v1324_v13  ;;  %1389 = vadd.xlane.f32.xlu1 %v3556_v23  ;;  %v1326_v61 = vpop.xlane.xlu1 %1325 }
 0x30b   : > { %2590 = vpow2.f32 %v1369_v21  ;;  %v1342_v34 = vsub.f32 %v3374_v63, %v1326_v61 }
 0x30c   : > { %v3562_v36 = vpop.eup %2580  ;;  %v1371_v55 = vmul.f32 1.442695, %v1341_v20 }
 0x30d   : > { %v3564_v30 = vpop.eup %2582  ;;  %v1373_v29 = vmul.f32 1.442695, %v1342_v34  ;;  %1391 = vadd.xlane.f32.xlu0 %v3562_v36 }
 0x30e   : > { %2592 = vpow2.f32 %v1371_v55  ;;  %1393 = vadd.xlane.f32.xlu1 %v3564_v30 }
 0x30f   : > { %2594 = vpow2.f32 %v1373_v29 }
 0x310   : > { %v3568_v25 = vpop.eup %2584 }
 0x311   : > { %v3570_v6 = vpop.eup %2586  ;;  %1395 = vadd.xlane.f32.xlu0 %v3568_v25 }
 0x312   : > { %1397 = vadd.xlane.f32.xlu1 %v3570_v6 }
 0x314   : > { %v3574_v63 = vpop.eup %2588 }
 0x315   : > { %v3576_v8 = vpop.eup %2590  ;;  %1399 = vadd.xlane.f32.xlu0 %v3574_v63 }
 0x316   : > { %1401 = vadd.xlane.f32.xlu1 %v3576_v8 }
 0x318   : > { %v3580_v12 = vpop.eup %2592 }
 0x319   : > { %v3582_v32 = vpop.eup %2594  ;;  %1403 = vadd.xlane.f32.xlu0 %v3580_v12 }
 0x31a   : > { %1405 = vadd.xlane.f32.xlu1 %v3582_v32 }
 0x38a   : > { %v1376_v39 = vpop.xlane.xlu0 %1375 }
 0x38b   : > { %v1378_v45 = vpop.xlane.xlu1 %1377  ;;  %2596 = vrcp.f32 %v1376_v39 }
 0x38c   : > { %2598 = vrcp.f32 %v1378_v45 }
 0x38e   : > { %v1380_v31 = vpop.xlane.xlu0 %1379 }
 0x38f   : > { %v1382_v7 = vpop.xlane.xlu1 %1381  ;;  %2600 = vrcp.f32 %v1380_v31 }
 0x390   : > { %2602 = vrcp.f32 %v1382_v7 }
 0x392   : > { %v1384_v27 = vpop.xlane.xlu0 %1383 }
 0x393   : > { %v1386_v14 = vpop.xlane.xlu1 %1385  ;;  %2604 = vrcp.f32 %v1384_v27 }
 0x394   : > { %2606 = vrcp.f32 %v1386_v14 }
 0x395   : > { %v2597_v39 = vpop.eup %2596 }
 0x396   : > { %v1388_v21 = vpop.xlane.xlu0 %1387 }
 0x397   : > { %v1390_v61 = vpop.xlane.xlu1 %1389  ;;  %2608 = vrcp.f32 %v1388_v21 }
 0x398   : > { %2610 = vrcp.f32 %v1390_v61 }
 0x39a   : > { %v1392_v55 = vpop.xlane.xlu0 %1391 }
 0x39b   : > { %v1394_v45 = vpop.xlane.xlu1 %1393  ;;  %2612 = vrcp.f32 %v1392_v55 }
 0x39c   : > { %2614 = vrcp.f32 %v1394_v45 }
 0x3b7   : > { %v2177_v52 = vpop.f32.mrb[0].mxu1 }
 0x3b8   : > { %v784_v49 = vpop.f32.mrb[1].mxu1 }
 0x3b9   : > { %v2178_v46 = vpop.f32.mrb[2].mxu1 }
 0x3ba   : > { %v848_v0 = vpack.c.bf16 %v2178_v46, %v2177_v52  ;;  %v787_v41 = vpop.f32.mrb[3].mxu1  ;;  %v2599_v52 = vpop.eup %2598 }
 0x3bb   : > { %v847_v5 = vpack.c.bf16 %v787_v41, %v784_v49  ;;  %v1424_v7 = vmul.f32 %v2599_v52, %v3532_v19  ;;  %v2601_v41 = vpop.eup %2600 }
 0x3bd   : > { %2195 = vmatprep.mubr.msk.bf16.mxu1 %vm332_vm0, %v847_v5  ;;  %v1398_v5 = vpop.xlane.xlu1 %1397  ;;  %v1440_v19 = vmul.f32 %v1424_v7, %v3461_v50 }
 0x3be   : > { %2196 = vmatmul.mubr.msk.bf16.vlgmr.msra.gmra.mrb[16].mxu1 %vm332_vm0, %v848_v0  ;;  %v1396_v0 = vpop.xlane.xlu0 %1395 }
 0x3bf   : > { %2268 = vmatpush3.bf16.msra.mxu1 %v3158_v28  ;;  %v2181_v53 = vpop.f32.mrb[4].mxu1  ;;  %2616 = vrcp.f32 %v1396_v0 }
 0x3c0   : > { %v800_v60 = vpop.f32.mrb[5].mxu1  ;;  %2269 = vmatprep.subr.bf16.mxu1 %v3173_v33  ;;  %2618 = vrcp.f32 %v1398_v5 }
 0x3c1   : > { %v2182_v48 = vpop.f32.mrb[6].mxu1 }
 0x3c2   : > { %v850_v13 = vpack.c.bf16 %v2182_v48, %v2181_v53  ;;  %v803_v20 = vpop.f32.mrb[7].mxu1 }
 0x3c3   : > { %v849_v34 = vpack.c.bf16 %v803_v20, %v800_v60  ;;  %2270 = vmatpush3.bf16.msra.mxu1 %v3173_v33 }
 0x3c4   : > { %2271 = vmatprep.subr.bf16.mxu1 %v3192_v40 }
 0x3c5   : > { %2199 = vmatprep.mubr.msk.bf16.mxu1 %vm332_vm0, %v849_v34  ;;  %v1400_v34 = vpop.xlane.xlu0 %1399 }
 0x3c6   : > { %2200 = vmatmul.mubr.msk.bf16.gmra.mrb[20].mxu1 %vm332_vm0, %v850_v13  ;;  %2620 = vrcp.f32 %v1400_v34 }
 0x3c7   : > { %2272 = vmatpush3.bf16.msra.mxu1 %v3192_v40  ;;  %v2185_v28 = vpop.f32.mrb[8].mxu1  ;;  %v1423_v40 = vmul.f32 %v2597_v39, %v3530_v35 }
 0x3c8   : > { %v816_v29 = vpop.f32.mrb[9].mxu1  ;;  %2273 = vmatprep.subr.bf16.mxu1 %v3208_v47 }
 0x3c9   : > { %v2186_v33 = vpop.f32.mrb[10].mxu1  ;;  %v1439_v35 = vmul.f32 %v1423_v40, %v3459_v51 }
 0x3ca   : > { %v852_v49 = vpack.c.bf16 %v2186_v33, %v2185_v28  ;;  %v819_v31 = vpop.f32.mrb[11].mxu1  ;;  %v1402_v28 = vpop.xlane.xlu1 %1401 }
 0x3cb   : > { %v851_v46 = vpack.c.bf16 %v819_v31, %v816_v29  ;;  %2274 = vmatpush3.bf16.msra.mxu1 %v3208_v47  ;;  %v2603_v47 = vpop.eup %2602  ;;  %v1455_v51 = vpack.c.bf16 %v1440_v19, %v1439_v35  ;;  %2622 = vrcp.f32 %v1402_v28  ;;  %v1404_v33 = vpop.xlane.xlu0 %1403 }
 0x3cc   : > { %2275 = vmatprep.subr.bf16.mxu1 %v3225_v54  ;;  %v2605_v53 = vpop.eup %2604  ;;  %v1426_v61 = vmul.f32 %v2603_v47, %v3540_v43  ;;  %2624 = vrcp.f32 %v1404_v33 }
 0x3cd   : > { %2203 = vmatprep.mubr.msk.bf16.mxu1 %vm332_vm0, %v851_v46  ;;  %v2607_v48 = vpop.eup %2606  ;;  %v1427_v50 = vmul.f32 %v2605_v53, %v3546_v3 }
 0x3ce   : > { %2204 = vmatmul.mubr.msk.bf16.gmra.mrb[24].mxu1 %vm332_vm0, %v852_v49  ;;  %v1428_v55 = vmul.f32 %v2607_v48, %v3548_v15  ;;  %v1442_v29 = vmul.f32 %v1426_v61, %v3468_v1  ;;  %v1406_v52 = vpop.xlane.xlu1 %1405 }
 0x3cf   : > { %2276 = vmatpush3.bf16.msra.mxu1 %v3225_v54  ;;  %v2189_v27 = vpop.f32.mrb[12].mxu1  ;;  %v1425_v54 = vmul.f32 %v2601_v41, %v3538_v22  ;;  %v1443_v3 = vmul.f32 %v1427_v50, %v3474_v37  ;;  %2626 = vrcp.f32 %v1406_v52 }
 0x3d0   : > { %v832_v14 = vpop.f32.mrb[13].mxu1  ;;  %2277 = vmatprep.subr.bf16.mxu1 %v3240_v59  ;;  %v1444_v15 = vmul.f32 %v1428_v55, %v3476_v44 }
 0x3d1   : > { %v2190_v60 = vpop.f32.mrb[14].mxu1  ;;  %v1441_v43 = vmul.f32 %v1425_v54, %v3466_v57 }
 0x3d2   : > { %v854_v21 = vpack.c.bf16 %v2190_v60, %v2189_v27  ;;  %v835_v13 = vpop.f32.mrb[15].mxu1  ;;  %v1457_v1 = vpack.c.bf16 %v1444_v15, %v1443_v3 }
 0x3d3   : > { %v853_v20 = vpack.c.bf16 %v835_v13, %v832_v14  ;;  %2278 = vmatpush3.bf16.msra.mxu1 %v3240_v59  ;;  %v2609_v59 = vpop.eup %2608 }
 0x3d4   : > { %2279 = vmatprep.subr.bf16.mxu1 %v3250_v62  ;;  %v2611_v22 = vpop.eup %2610  ;;  %v1429_v49 = vmul.f32 %v2609_v59, %v3554_v24 }
 0x3d5   : > { %2207 = vmatprep.mubr.msk.bf16.mxu1 %vm332_vm0, %v853_v20  ;;  %v2613_v39 = vpop.eup %2612  ;;  %v1430_v57 = vmul.f32 %v2611_v22, %v3556_v23 }
 0x3d6   : > { %2208 = vmatmul.mubr.msk.bf16.gmra.mrb[28].mxu1 %vm332_vm0, %v854_v21  ;;  %v2615_v45 = vpop.eup %2614  ;;  %v1431_v31 = vmul.f32 %v2613_v39, %v3562_v36  ;;  %v1445_v44 = vmul.f32 %v1429_v49, %v3482_v58 }
 0x3d7   : > { %2280 = vmatpush3.bf16.msra.mxu1 %v3250_v62  ;;  %2283 = vmatprep.mubr.bf16.mxu1 %v1455_v51  ;;  %v1456_v62 = vpack.c.bf16 %v1442_v29, %v1441_v43  ;;  %v1432_v46 = vmul.f32 %v2615_v45, %v3564_v30  ;;  %v2617_v37 = vpop.eup %2616  ;;  %v1446_v24 = vmul.f32 %v1430_v57, %v3484_v18 }
 0x3d8   : > { %2281 = vmatprep.subr.bf16.mxu1 %v3260_v2  ;;  %v1447_v40 = vmul.f32 %v1431_v31, %v3490_v26  ;;  %v1433_v0 = vmul.f32 %v2617_v37, %v3568_v25 }
 0x3d9   : > { %v1448_v36 = vmul.f32 %v1432_v46, %v3492_v38  ;;  %v1458_v7 = vpack.c.bf16 %v1446_v24, %v1445_v44 }
 0x3da   : > { %v1449_v26 = vmul.f32 %v1433_v0, %v3498_v9 }
 0x3db   : > { %2282 = vmatpush3.bf16.msra.mxu1 %v3260_v2  ;;  %v2619_v2 = vpop.eup %2618  ;;  %v1459_v41 = vpack.c.bf16 %v1448_v36, %v1447_v40 }
 0x3dc   : > { %2299 = vmatprep.subr.bf16.mxu1 %v3586_v10  ;;  %v2621_v23 = vpop.eup %2620 }
 0x3dd   : > { %v2623_v30 = vpop.eup %2622  ;;  %v1435_v58 = vmul.f32 %v2621_v23, %v3574_v63 }
 0x3de   : > { %2284 = vmatmul.mubr.bf16.vlgmr.msra.gmra.mrb[32].mxu1 %v1456_v62  ;;  %v1436_v18 = vmul.f32 %v2623_v30, %v3576_v8  ;;  %v2625_v5 = vpop.eup %2624 }
 0x3df   : > { %2287 = vmatprep.mubr.bf16.mxu1 %v1457_v1  ;;  %2300 = vmatpush3.bf16.msra.mxu1 %v3586_v10  ;;  %v1434_v10 = vmul.f32 %v2619_v2, %v3570_v6  ;;  %v2627_v27 = vpop.eup %2626  ;;  %v1437_v6 = vmul.f32 %v2625_v5, %v3580_v12 }
 0x3e0   : > { %2301 = vmatprep.subr.bf16.mxu1 %v3590_v42  ;;  %v1452_v47 = vmul.f32 %v1436_v18, %v3510_v4  ;;  %v1438_v63 = vmul.f32 %v2627_v27, %v3582_v32 }
 0x3e1   : > { %v1450_v38 = vmul.f32 %v1434_v10, %v3500_v56  ;;  %v1453_v8 = vmul.f32 %v1437_v6, %v3518_v11 }
 0x3e2   : > { %v1454_v9 = vmul.f32 %v1438_v63, %v3520_v16 }
 0x3e3   : > { %2302 = vmatpush3.bf16.msra.mxu1 %v3590_v42  ;;  %v1451_v42 = vmul.f32 %v1435_v58, %v3508_v17  ;;  %v1460_v25 = vpack.c.bf16 %v1450_v38, %v1449_v26 }
 0x3e4   : > { %v1462_v53 = vpack.c.bf16 %v1454_v9, %v1453_v8 }
 0x3e5   : > { %v1461_v14 = vpack.c.bf16 %v1452_v47, %v1451_v42 }
 0x3e6   : > { %2288 = vmatmul.mubr.bf16.gmra.mrb[36].mxu1 %v1458_v7 }
 0x3e7   : > { %2291 = vmatprep.mubr.bf16.mxu1 %v1459_v41 }
 0x3ee   : > { %2292 = vmatmul.mubr.bf16.gmra.mrb[40].mxu1 %v1460_v25 }
 0x3ef   : > { %2295 = vmatprep.mubr.bf16.mxu1 %v1461_v14 }
 0x3f6   : > { %2296 = vmatmul.mubr.bf16.gmra.mrb[44].mxu1 %v1462_v53 }
 0x491   : > { %v2197_v56 = vpop.f32.mrb[16].mxu1 }
 0x492   : > { %v990_v17 = vmax.f32 %v2197_v56, 0.0  ;;  %v925_v60 = vpop.f32.mrb[17].mxu1 }
 0x493   : > { %v988_v4 = vmax.f32 %v925_v60, 0.0  ;;  %v2198_v35 = vpop.f32.mrb[18].mxu1 }
 0x494   : > { %1007 = vst.msk [vmem:[%s3656_s21 + $0x10] sm:$0xff] %vm1004_vm2, %v990_v17  ;;  %v991_v11 = vmax.f32 %v2198_v35, 0.0  ;;  %v928_v16 = vpop.f32.mrb[19].mxu1 }
 0x495   : > { %1005 = vst.msk [vmem:[%s3656_s21] sm:$0xff] %vm1004_vm2, %v988_v4  ;;  %v989_v12 = vmax.f32 %v928_v16, 0.0 }
 0x496   : > { %1008 = vst.msk [vmem:[%s3656_s21 + $0x18] sm:$0xff] %vm1004_vm2, %v991_v11 }
 0x497   : > { %1006 = vst.msk [vmem:[%s3656_s21 + $0x8] sm:$0xff] %vm1004_vm2, %v989_v12 }
 0x499   : > { %v2201_v32 = vpop.f32.mrb[20].mxu1 }
 0x49a   : > { %v994_v19 = vmax.f32 %v2201_v32, 0.0  ;;  %v941_v48 = vpop.f32.mrb[21].mxu1 }
 0x49b   : > { %v992_v21 = vmax.f32 %v941_v48, 0.0  ;;  %v2202_v13 = vpop.f32.mrb[22].mxu1 }
 0x49c   : > { %1011 = vst.msk [vmem:[%s3656_s21 + $0x30] sm:$0xff] %vm1004_vm2, %v994_v19  ;;  %v995_v20 = vmax.f32 %v2202_v13, 0.0  ;;  %v944_v54 = vpop.f32.mrb[23].mxu1 }
 0x49d   : > { %1009 = vst.msk [vmem:[%s3656_s21 + $0x20] sm:$0xff] %vm1004_vm2, %v992_v21  ;;  %v993_v61 = vmax.f32 %v944_v54, 0.0 }
 0x49e   : > { %1012 = vst.msk [vmem:[%s3656_s21 + $0x38] sm:$0xff] %vm1004_vm2, %v995_v20 }
 0x49f   : > { %1010 = vst.msk [vmem:[%s3656_s21 + $0x28] sm:$0xff] %vm1004_vm2, %v993_v61 }
 0x4a1   : > { %v2205_v34 = vpop.f32.mrb[24].mxu1 }
 0x4a2   : > { %v998_v28 = vmax.f32 %v2205_v34, 0.0  ;;  %v957_v51 = vpop.f32.mrb[25].mxu1 }
 0x4a3   : > { %v996_v50 = vmax.f32 %v957_v51, 0.0  ;;  %v2206_v55 = vpop.f32.mrb[26].mxu1 }
 0x4a4   : > { %1015 = vst.msk [vmem:[%s3656_s21 + $0x50] sm:$0xff] %vm1004_vm2, %v998_v28  ;;  %v999_v59 = vmax.f32 %v2206_v55, 0.0  ;;  %v960_v22 = vpop.f32.mrb[27].mxu1 }
 0x4a5   : > { %1013 = vst.msk [vmem:[%s3656_s21 + $0x40] sm:$0xff] %vm1004_vm2, %v996_v50  ;;  %v997_v43 = vmax.f32 %v960_v22, 0.0 }
 0x4a6   : > { %1016 = vst.msk [vmem:[%s3656_s21 + $0x58] sm:$0xff] %vm1004_vm2, %v999_v59 }
 0x4a7   : > { %1014 = vst.msk [vmem:[%s3656_s21 + $0x48] sm:$0xff] %vm1004_vm2, %v997_v43 }
 0x4a9   : > { %v2209_v29 = vpop.f32.mrb[28].mxu1 }
 0x4aa   : > { %v1002_v39 = vmax.f32 %v2209_v29, 0.0  ;;  %v973_v3 = vpop.f32.mrb[29].mxu1 }
 0x4ab   : > { %v1000_v15 = vmax.f32 %v973_v3, 0.0  ;;  %v2210_v45 = vpop.f32.mrb[30].mxu1 }
 0x4ac   : > { %1019 = vst.msk [vmem:[%s3656_s21 + $0x70] sm:$0xff] %vm1004_vm2, %v1002_v39  ;;  %v1003_v33 = vmax.f32 %v2210_v45, 0.0  ;;  %v976_v52 = vpop.f32.mrb[31].mxu1 }
 0x4ad   : > { %1017 = vst.msk [vmem:[%s3656_s21 + $0x60] sm:$0xff] %vm1004_vm2, %v1000_v15  ;;  %v1001_v62 = vmax.f32 %v976_v52, 0.0 }
 0x4ae   : > { %1020 = vst.msk [vmem:[%s3656_s21 + $0x78] sm:$0xff] %vm1004_vm2, %v1003_v33 }
 0x4af   : > { %1018 = vst.msk [vmem:[%s3656_s21 + $0x68] sm:$0xff] %vm1004_vm2, %v1001_v62 }
 0x4b1   : > { %v2285_v49 = vpop.f32.mrb[32].mxu1 }
 0x4b2   : > { %v1505_v57 = vpop.f32.mrb[33].mxu1 }
 0x4b3   : > { %v2286_v1 = vpop.f32.mrb[34].mxu1 }
 0x4b4   : > { %v1569_v31 = vpack.c.bf16 %v2286_v1, %v2285_v49  ;;  %v1508_v46 = vpop.f32.mrb[35].mxu1 }
 0x4b5   : > { %v1568_v37 = vpack.c.bf16 %v1508_v46, %v1505_v57 }
 0x4b7   : > { %2303 = vmatprep.mubr.msk.bf16.mxu1 %vm332_vm0, %v1568_v37 }
 0x4b8   : > { %2304 = vmatmul.mubr.msk.bf16.vlgmr.msra.gmra.mrb[48].mxu1 %vm332_vm0, %v1569_v31 }
 0x4b9   : > { %v2289_v2 = vpop.f32.mrb[36].mxu1 }
 0x4ba   : > { %v1521_v44 = vpop.f32.mrb[37].mxu1 }
 0x4bb   : > { %v2290_v24 = vpop.f32.mrb[38].mxu1 }
 0x4bc   : > { %v1571_v23 = vpack.c.bf16 %v2290_v24, %v2289_v2  ;;  %v1524_v40 = vpop.f32.mrb[39].mxu1 }
 0x4bd   : > { %v1570_v36 = vpack.c.bf16 %v1524_v40, %v1521_v44 }
 0x4bf   : > { %2307 = vmatprep.mubr.msk.bf16.mxu1 %vm332_vm0, %v1570_v36 }
 0x4c0   : > { %2308 = vmatmul.mubr.msk.bf16.gmra.mrb[52].mxu1 %vm332_vm0, %v1571_v23 }
 0x4c1   : > { %v2293_v30 = vpop.f32.mrb[40].mxu1 }
 0x4c2   : > { %v1537_v7 = vpop.f32.mrb[41].mxu1 }
 0x4c3   : > { %v2294_v0 = vpop.f32.mrb[42].mxu1 }
 0x4c4   : > { %v1573_v10 = vpack.c.bf16 %v2294_v0, %v2293_v30  ;;  %v1540_v41 = vpop.f32.mrb[43].mxu1 }
 0x4c5   : > { %v1572_v58 = vpack.c.bf16 %v1540_v41, %v1537_v7 }
 0x4c7   : > { %2311 = vmatprep.mubr.msk.bf16.mxu1 %vm332_vm0, %v1572_v58 }
 0x4c8   : > { %2312 = vmatmul.mubr.msk.bf16.gmra.mrb[56].mxu1 %vm332_vm0, %v1573_v10 }
 0x4c9   : > { %v2297_v18 = vpop.f32.mrb[44].mxu1 }
 0x4ca   : > { %v1553_v5 = vpop.f32.mrb[45].mxu1 }
 0x4cb   : > { %v2298_v26 = vpop.f32.mrb[46].mxu1 }
 0x4cc   : > { %v1575_v38 = vpack.c.bf16 %v2298_v26, %v2297_v18  ;;  %v1556_v27 = vpop.f32.mrb[47].mxu1 }
 0x4cd   : > { %v1574_v42 = vpack.c.bf16 %v1556_v27, %v1553_v5 }
 0x4cf   : > { %2315 = vmatprep.mubr.msk.bf16.mxu1 %vm332_vm0, %v1574_v42 }
 0x4d0   : > { %2316 = vmatmul.mubr.msk.bf16.gmra.mrb[60].mxu1 %vm332_vm0, %v1575_v38 }
 0x58b   : > { %v2305_v47 = vpop.f32.mrb[48].mxu1 }
 0x58c   : > { %v1699_v25 = vmax.f32 %v2305_v47, 0.0  ;;  %v1634_v6 = vpop.f32.mrb[49].mxu1 }
 0x58d   : > { %v1697_v63 = vmax.f32 %v1634_v6, 0.0  ;;  %v2306_v14 = vpop.f32.mrb[50].mxu1 }
 0x58e   : > { %1963 = vst.msk [vmem:[%s3656_s21 + $0x90] sm:$0xff] %vm1004_vm2, %v1699_v25  ;;  %v1700_v8 = vmax.f32 %v2306_v14, 0.0  ;;  %v1637_v9 = vpop.f32.mrb[51].mxu1 }
 0x58f   : > { %1961 = vst.msk [vmem:[%s3656_s21 + $0x80] sm:$0xff] %vm1004_vm2, %v1697_v63  ;;  %v1698_v53 = vmax.f32 %v1637_v9, 0.0 }
 0x590   : > { %1964 = vst.msk [vmem:[%s3656_s21 + $0x98] sm:$0xff] %vm1004_vm2, %v1700_v8 }
 0x591   : > { %1962 = vst.msk [vmem:[%s3656_s21 + $0x88] sm:$0xff] %vm1004_vm2, %v1698_v53 }
 0x593   : > { %v2309_v56 = vpop.f32.mrb[52].mxu1 }
 0x594   : > { %v1703_v17 = vmax.f32 %v2309_v56, 0.0  ;;  %v1650_v60 = vpop.f32.mrb[53].mxu1 }
 0x595   : > { %v1701_v4 = vmax.f32 %v1650_v60, 0.0  ;;  %v2310_v35 = vpop.f32.mrb[54].mxu1 }
 0x596   : > { %1967 = vst.msk [vmem:[%s3656_s21 + $0xb0] sm:$0xff] %vm1004_vm2, %v1703_v17  ;;  %v1704_v11 = vmax.f32 %v2310_v35, 0.0  ;;  %v1653_v16 = vpop.f32.mrb[55].mxu1 }
 0x597   : > { %1965 = vst.msk [vmem:[%s3656_s21 + $0xa0] sm:$0xff] %vm1004_vm2, %v1701_v4  ;;  %v1702_v12 = vmax.f32 %v1653_v16, 0.0 }
 0x598   : > { %1968 = vst.msk [vmem:[%s3656_s21 + $0xb8] sm:$0xff] %vm1004_vm2, %v1704_v11 }
 0x599   : > { %1966 = vst.msk [vmem:[%s3656_s21 + $0xa8] sm:$0xff] %vm1004_vm2, %v1702_v12 }
 0x59b   : > { %v2313_v32 = vpop.f32.mrb[56].mxu1 }
 0x59c   : > { %v1707_v19 = vmax.f32 %v2313_v32, 0.0  ;;  %v1666_v48 = vpop.f32.mrb[57].mxu1 }
 0x59d   : > { %v1705_v21 = vmax.f32 %v1666_v48, 0.0  ;;  %v2314_v13 = vpop.f32.mrb[58].mxu1 }
 0x59e   : > { %1971 = vst.msk [vmem:[%s3656_s21 + $0xd0] sm:$0xff] %vm1004_vm2, %v1707_v19  ;;  %v1708_v20 = vmax.f32 %v2314_v13, 0.0  ;;  %v1669_v54 = vpop.f32.mrb[59].mxu1 }
 0x59f   : > { %1969 = vst.msk [vmem:[%s3656_s21 + $0xc0] sm:$0xff] %vm1004_vm2, %v1705_v21  ;;  %v1706_v61 = vmax.f32 %v1669_v54, 0.0 }
 0x5a0   : > { %1972 = vst.msk [vmem:[%s3656_s21 + $0xd8] sm:$0xff] %vm1004_vm2, %v1708_v20 }
 0x5a1   : > { %1970 = vst.msk [vmem:[%s3656_s21 + $0xc8] sm:$0xff] %vm1004_vm2, %v1706_v61 }
 0x5a3   : > { %v2317_v34 = vpop.f32.mrb[60].mxu1 }
 0x5a4   : > { %v1711_v28 = vmax.f32 %v2317_v34, 0.0  ;;  %v1682_v51 = vpop.f32.mrb[61].mxu1 }
 0x5a5   : > { %v1709_v50 = vmax.f32 %v1682_v51, 0.0  ;;  %v2318_v55 = vpop.f32.mrb[62].mxu1 }
 0x5a6   : > { %1975 = vst.msk [vmem:[%s3656_s21 + $0xf0] sm:$0xff] %vm1004_vm2, %v1711_v28  ;;  %v1712_v59 = vmax.f32 %v2318_v55, 0.0  ;;  %v1685_v22 = vpop.f32.mrb[63].mxu1 }
 0x5a7   : > { %1973 = vst.msk [vmem:[%s3656_s21 + $0xe0] sm:$0xff] %vm1004_vm2, %v1709_v50  ;;  %v1710_v43 = vmax.f32 %v1685_v22, 0.0 }
 0x5a8   : > { %1976 = vst.msk [vmem:[%s3656_s21 + $0xf8] sm:$0xff] %vm1004_vm2, %v1712_v59 }
 0x5a9   : > { %1974 = vst.msk [vmem:[%s3656_s21 + $0xe8] sm:$0xff] %vm1004_vm2, %v1710_v43 }
 0x5aa   : > { %2755 = shalt.err (!%p2752_p4)
}
 0x5ab   : > { %s2756_s7 = scalar_lea.hbm %s3729_s28, 4096  ;;  %s2760_s24 = scalar_lea.hbm %s3785_s4, 8192 }
 0x5ac   : > { %p2757_p9 = scmp.ne.s32.totalorder %s3729_s28, %s2756_s7  ;;  %p2761_p8 = scmp.lt.u32.totalorder %s3729_s28, %s3785_s4 }
 0x5ad   : > { %p2762_p13 = scmp.lt.u32.totalorder %s2760_s24, %s2756_s7  ;;  %p2764_p10 = scmp.lt.u32.totalorder %s2756_s7, %s3729_s28 }
 0x5ae   : > { %p2758_p0 = pnand %p2757_p9, %p3005_p5 }
 0x5af   : > { %p2763_p6 = por %p2762_p13, %p2761_p8 }
 0x5b0   : > { %p2759_p11 = pneg %p2758_p0 }
 0x5b1   : > { %p2765_p3 = por %p2764_p10, %p2763_p6 }
 0x5b3   : > { %p2766_p7 = pnand %p2765_p3, %p2759_p11 }
 0x5b5   : > { %2769 = shalt.err (!%p2766_p7)
}
 0x5b6   : > { %s2827_s21 = smov 128   ;;  %s2828_s23 = smov 8  }
 0x5b7   : > { %2429 = dma.vmem_to_hbm [thread:$0]  (%p3005_p5), %s3731_s14, 4096, %s3729_s28, %s1731_s19, %s2827_s21, %s2827_s21, %s2828_s23  }
 0x5b8 PF: > { %s1760_s20 = sand.u32 1, %s2804_s15   ;;  %p3805_p12 = scmp.ne.s32.totalorder %s3790_s22, 0 }
 0x5b9   : > { %p3806_p1 = scmp.ge.s32.totalorder %s2816_s18, 2  ;;  %s1761_s8 = scalar_lea.sflag [#allocation4], %s1760_s20 }
 0x5bb   : > { %p2446_p2 = pnand %p3806_p1, %p3805_p12 }
 0x5bd   : > { %2799 = dma.done.wait (!%p2446_p2), %s1761_s8, 4096  }
 0x5be   : > { %2801 = vsyncadd (!%p2446_p2), %s1761_s8, 4294963200  ;;  %p19_p4 = scmp.ge.s32.totalorder %s2991_s12, 4   ;;  %s3807_s15 = smov %s2808_s16 }
 0x5bf   : > { %s3808_s16 = smov %s2812_s17  ;;  %s3809_s17 = smov %s3001_s27 }
 0x5c0   : > { %s3810_s18 = smov %s2991_s12  ;;  %21 = sbr.rel (!%p19_p4) target bundleno = 7 (0x7), region = 95 }
 0x5c7   :  { %1766 = vsyncpa [#allocation3], 1 }
 0x5c8   :  { %1768 = vsyncpa [#allocation3 + $0x1], 1 }
 0x5c9   :  { %1769 = vsyncpa [#allocation6], 1 }
 0x5ca   :  { %1770 = vsyncpa [#allocation9], 1 }
 0x5cb   :  { %1771 = vsyncpa [#allocation4], 1 }
 0x5cc   :  { %1773 = vsyncpa [#allocation4 + $0x1], 1 }

</bundles_post_ra>
